<compile_context>
chip_gen: v7x
topology: tpu7x:2x2x1
jax: 0.10.0
libtpu: 0.0.40
codegen_flags: <defaults>
</compile_context>

<pallas_src>
import functools

import jax
import jax.numpy as jnp
from jax.experimental import pallas as pl
from jax.experimental.pallas import tpu as pltpu

HEAD_WIDTH = 128  # lane-dense fused-head output width ([mu|logvar|zero-pad])


def _round_up(n, m):
    return ((n + m - 1) // m) * m


def _encoder_kernel(x_ref, z_ref, w1x_ref, w1z_ref, b1_ref,
                    w2_ref, b2_ref, whead_ref, bhead_ref, out_ref):
    cdt = w1x_ref.dtype  # compute dtype for MXU inputs (bf16 by default)

    # Layer 1: h1 = ReLU(x @ W1x + z @ W1z + b1)   (split-weight form of the concat)
    x = x_ref[...].astype(cdt)
    z = z_ref[...].astype(cdt)
    h1 = jnp.dot(x, w1x_ref[...], preferred_element_type=jnp.float32)
    h1 = h1 + jnp.dot(z, w1z_ref[...], preferred_element_type=jnp.float32)
    h1 = jnp.maximum(h1 + b1_ref[...], 0.0)

    # Layer 2: h2 = ReLU(h1 @ W2 + b2)
    h2 = jnp.dot(h1.astype(cdt), w2_ref[...], preferred_element_type=jnp.float32)
    h2 = jnp.maximum(h2 + b2_ref[...], 0.0)

    # Fused heads (lane-dense, zero-padded to 128 cols):
    #   [mu | logvar | 0...] = h2 @ [Wmu | Wlv | 0] + [bmu | blv | 0]
    out = jnp.dot(h2.astype(cdt), whead_ref[...], preferred_element_type=jnp.float32)
    out_ref[...] = (out + bhead_ref[...]).astype(out_ref.dtype)


def prepare_params(params, input_dim, weight_dtype=jnp.bfloat16):
    """One-time weight prep: split W1, fuse + lane-pad the heads, cast to bf16.

    `params` are in the (in_features, out_features) layout:
      (w1, b1, w2, b2, wmu, bmu, wlv, blv)
    """
    w1, b1, w2, b2, wmu, bmu, wlv, blv = params
    w1x = w1[:input_dim].astype(weight_dtype)          # (input_dim, H)
    w1z = w1[input_dim:].astype(weight_dtype)          # (latent_z, H)
    w2p = w2.astype(weight_dtype)                      # (H, H)

    whead = jnp.concatenate([wmu, wlv], axis=1)        # (H, 2C)
    bhead = jnp.concatenate([bmu, blv], axis=1)        # (1, 2C)
    head_w = max(HEAD_WIDTH, _round_up(whead.shape[1], 128))
    pad = head_w - whead.shape[1]
    whead = jnp.pad(whead, ((0, 0), (0, pad))).astype(weight_dtype)   # (H, head_w)
    bhead = jnp.pad(bhead, ((0, 0), (0, pad))).astype(jnp.float32)    # (1, head_w)

    return (w1x, w1z, b1.astype(jnp.float32), w2p,
            b2.astype(jnp.float32), whead, bhead)


@functools.partial(jax.jit, static_argnames=("latent_c", "block_b"))
def client_encoder_forward(x, z, prep_params, *, latent_c, block_b=512):
    """Pallas forward of ClientEncoder.

    x: (B, input_dim), z: (B, latent_z), prep_params from prepare_params().
    Returns (mu, logvar), each (B, latent_c).
    """
    w1x, w1z, b1, w2, b2, whead, bhead = prep_params
    B, Dx = x.shape
    Dz = z.shape[1]
    H = w1x.shape[1]
    head_w = whead.shape[1]
    C = latent_c

    # Batch tile: as large as requested, but small enough that the grid has at
    # least 2 tiles when B > 8 (so both v7x TensorCores are used).  The grid
    # uses cdiv, so B need not be a multiple of block_b: the trailing partial
    # block's OOB output rows are dropped by Pallas (no jnp.pad HBM copy).
    half = _round_up(max(1, -(-B // 2)), 8)
    block_b = max(8, min(block_b, half))
    grid = (pl.cdiv(B, block_b),)

    full = lambda shape: pl.BlockSpec(shape, lambda i: (0, 0))  # weights resident
    in_specs = [
        pl.BlockSpec((block_b, Dx), lambda i: (i, 0)),   # x tile over batch
        pl.BlockSpec((block_b, Dz), lambda i: (i, 0)),   # z tile over batch
        full((Dx, H)), full((Dz, H)), full((1, H)),      # W1x, W1z, b1
        full((H, H)), full((1, H)),                      # W2, b2
        full((H, head_w)), full((1, head_w)),            # [Wmu|Wlv|0], [bmu|blv|0]
    ]
    out_specs = pl.BlockSpec((block_b, head_w), lambda i: (i, 0))

    weight_bytes = sum(int(a.size) * a.dtype.itemsize
                       for a in (w1x, w1z, b1, w2, b2, whead, bhead))
    cost = pl.CostEstimate(
        flops=2 * B * ((Dx + Dz) * H + H * H + H * head_w),
        transcendentals=0,
        bytes_accessed=(B * Dx * x.dtype.itemsize + B * Dz * z.dtype.itemsize
                        + weight_bytes + B * head_w * 4),
    )

    out = pl.pallas_call(
        _encoder_kernel,
        out_shape=jax.ShapeDtypeStruct((B, head_w), x.dtype),
        grid=grid,
        in_specs=in_specs,
        out_specs=out_specs,
        compiler_params=pltpu.CompilerParams(
            dimension_semantics=("parallel",),     # shard batch tiles across TCs
            vmem_limit_bytes=48 * 1024 * 1024,     # > v5e/v6e default, < v7x 64 MiB
        ),
        cost_estimate=cost,
    )(x, z, w1x, w1z, b1, w2, b2, whead, bhead)

    mu = out[:, :C]
    logvar = out[:, C:2 * C]
    return mu, logvar


def init_params(key, input_dim, latent_z, hidden_dim, latent_c, dtype=jnp.float32):
    """Deterministic synthetic parameters (weights stored (in, out))."""
    ks = jax.random.split(key, 8)
    s = 0.05
    din = input_dim + latent_z
    w1 = s * jax.random.normal(ks[0], (din, hidden_dim), dtype)
    b1 = s * jax.random.normal(ks[1], (1, hidden_dim), dtype)
    w2 = s * jax.random.normal(ks[2], (hidden_dim, hidden_dim), dtype)
    b2 = s * jax.random.normal(ks[3], (1, hidden_dim), dtype)
    wmu = s * jax.random.normal(ks[4], (hidden_dim, latent_c), dtype)
    bmu = s * jax.random.normal(ks[5], (1, latent_c), dtype)
    wlv = s * jax.random.normal(ks[6], (hidden_dim, latent_c), dtype)
    blv = s * jax.random.normal(ks[7], (1, latent_c), dtype)
    return (w1, b1, w2, b2, wmu, bmu, wlv, blv)


def reference_forward_f32(x, z, params):
    """Pure-JAX f32 reference matching the PyTorch module exactly."""
    w1, b1, w2, b2, wmu, bmu, wlv, blv = params
    xz = jnp.concatenate([x, z], axis=1)
    h = jnp.maximum(xz @ w1 + b1, 0.0)
    h = jnp.maximum(h @ w2 + b2, 0.0)
    return h @ wmu + bmu, h @ wlv + blv


def reference_forward_matched(x, z, prep_params, latent_c):
    """Pure-JAX reference mirroring the kernel's bf16-weight MXU path
    (f32 accumulation), for tight numerical comparison."""
    w1x, w1z, b1, w2, b2, whead, bhead = prep_params
    cdt = w1x.dtype
    h1 = (jnp.dot(x.astype(cdt), w1x, preferred_element_type=jnp.float32)
          + jnp.dot(z.astype(cdt), w1z, preferred_element_type=jnp.float32))
    h1 = jnp.maximum(h1 + b1, 0.0)
    h2 = jnp.dot(h1.astype(cdt), w2, preferred_element_type=jnp.float32)
    h2 = jnp.maximum(h2 + b2, 0.0)
    out = jnp.dot(h2.astype(cdt), whead, preferred_element_type=jnp.float32) + bhead
    return out[:, :latent_c], out[:, latent_c:2 * latent_c]


if __name__ == "__main__":
    # Module-level constants from FEDav.py; batch kept small for the smoke test.
    input_dim, latent_z, hidden_dim, latent_c = 784, 25, 400, 3
    batch = 8

    key = jax.random.PRNGKey(0)
    kx, kz, kp = jax.random.split(key, 3)
    params = init_params(kp, input_dim, latent_z, hidden_dim, latent_c)

    # One-time weight prep (split W1, fuse + lane-pad heads, cast to bf16).
    prep = prepare_params(params, input_dim)

    x = jax.random.normal(kx, (batch, input_dim), jnp.float32)
    z = jax.random.normal(kz, (batch, latent_z), jnp.float32)

    mu, logvar = client_encoder_forward(x, z, prep, latent_c=latent_c)
    jax.block_until_ready((mu, logvar))
    assert mu.shape == (batch, latent_c) and logvar.shape == (batch, latent_c)

    # Tight check vs. a reference using the same bf16 MXU path.
    mu_m, lv_m = reference_forward_matched(x, z, prep, latent_c)
    assert jnp.allclose(mu, mu_m, atol=5e-3, rtol=5e-3)
    assert jnp.allclose(logvar, lv_m, atol=5e-3, rtol=5e-3)

    # Loose check vs. the original full-f32 module semantics (bf16 weight error).
    mu_f, lv_f = reference_forward_f32(x, z, params)
    assert jnp.allclose(mu, mu_f, atol=1e-1, rtol=1e-1)
    assert jnp.allclose(logvar, lv_f, atol=1e-1, rtol=1e-1)

    # Non-divisible batch: exercises the cdiv grid + masked trailing block
    # (OOB output rows dropped) instead of a jnp.pad HBM copy.
    batch2 = 13
    kx2, kz2 = jax.random.split(jax.random.PRNGKey(1), 2)
    x2 = jax.random.normal(kx2, (batch2, input_dim), jnp.float32)
    z2 = jax.random.normal(kz2, (batch2, latent_z), jnp.float32)
    mu2, lv2 = client_encoder_forward(x2, z2, prep, latent_c=latent_c)
    jax.block_until_ready((mu2, lv2))
    mu2_m, lv2_m = reference_forward_matched(x2, z2, prep, latent_c)
    assert mu2.shape == (batch2, latent_c) and lv2.shape == (batch2, latent_c)
    assert jnp.allclose(mu2, mu2_m, atol=5e-3, rtol=5e-3)
    assert jnp.allclose(lv2, lv2_m, atol=5e-3, rtol=5e-3)

    print("KERNEL_OK")
</pallas_src>

<mosaic_0001>
module attributes {stable_mosaic.version = 11 : i64} {
  func.func @_encoder_kernel(%arg0: i32, %arg1: memref<8x784xf32, #tpu.memory_space<vmem>>, %arg2: memref<8x25xf32, #tpu.memory_space<vmem>>, %arg3: memref<784x400xbf16, #tpu.memory_space<vmem>>, %arg4: memref<25x400xbf16, #tpu.memory_space<vmem>>, %arg5: memref<1x400xf32, #tpu.memory_space<vmem>>, %arg6: memref<400x400xbf16, #tpu.memory_space<vmem>>, %arg7: memref<1x400xf32, #tpu.memory_space<vmem>>, %arg8: memref<400x128xbf16, #tpu.memory_space<vmem>>, %arg9: memref<1x128xf32, #tpu.memory_space<vmem>>, %arg10: memref<8x128xf32, #tpu.memory_space<vmem>>) attributes {dimension_semantics = [#tpu.dimension_semantics<parallel>], iteration_bounds = array<i64: 1>, scalar_prefetch = 0 : i64, scratch_operands = 0 : i64, tpu.core_type = #tpu.core_type<tc>, window_params = [{transform_indices = @transform_0, window_bounds = array<i64: 8, 784>}, {transform_indices = @transform_1, window_bounds = array<i64: 8, 25>}, {pipeline_mode = #tpu.pipeline_mode<synchronous>, transform_indices = @transform_2, window_bounds = array<i64: 784, 400>}, {pipeline_mode = #tpu.pipeline_mode<synchronous>, transform_indices = @transform_3, window_bounds = array<i64: 25, 400>}, {pipeline_mode = #tpu.pipeline_mode<synchronous>, transform_indices = @transform_4, window_bounds = array<i64: 1, 400>}, {pipeline_mode = #tpu.pipeline_mode<synchronous>, transform_indices = @transform_5, window_bounds = array<i64: 400, 400>}, {pipeline_mode = #tpu.pipeline_mode<synchronous>, transform_indices = @transform_6, window_bounds = array<i64: 1, 400>}, {pipeline_mode = #tpu.pipeline_mode<synchronous>, transform_indices = @transform_7, window_bounds = array<i64: 400, 128>}, {pipeline_mode = #tpu.pipeline_mode<synchronous>, transform_indices = @transform_8, window_bounds = array<i64: 1, 128>}, {transform_indices = @transform_9, window_bounds = array<i64: 8, 128>}]} {
    %c0 = arith.constant 0 : index
    %c0_0 = arith.constant 0 : index
    %0 = vector.load %arg1[%c0, %c0_0] : memref<8x784xf32, #tpu.memory_space<vmem>>, vector<8x784xf32>
    %1 = arith.truncf %0 : vector<8x784xf32> to vector<8x784xbf16>
    %c0_1 = arith.constant 0 : index
    %c0_2 = arith.constant 0 : index
    %2 = vector.load %arg2[%c0_1, %c0_2] : memref<8x25xf32, #tpu.memory_space<vmem>>, vector<8x25xf32>
    %3 = arith.truncf %2 : vector<8x25xf32> to vector<8x25xbf16>
    %c0_3 = arith.constant 0 : index
    %c0_4 = arith.constant 0 : index
    %4 = vector.load %arg3[%c0_3, %c0_4] : memref<784x400xbf16, #tpu.memory_space<vmem>>, vector<784x400xbf16>
    %cst = arith.constant dense<0.000000e+00> : vector<8x400xf32>
    %5 = tpu.matmul %1, %4, %cst {dimension_numbers = #tpu.dot_dimension_numbers<[1], [0], [0], [1], [0, 0, 1, 1], [], []>} : vector<8x784xbf16>, vector<784x400xbf16>, vector<8x400xf32> -> vector<8x400xf32>
    %c0_5 = arith.constant 0 : index
    %c0_6 = arith.constant 0 : index
    %6 = vector.load %arg4[%c0_5, %c0_6] : memref<25x400xbf16, #tpu.memory_space<vmem>>, vector<25x400xbf16>
    %cst_7 = arith.constant dense<0.000000e+00> : vector<8x400xf32>
    %7 = tpu.matmul %3, %6, %cst_7 {dimension_numbers = #tpu.dot_dimension_numbers<[1], [0], [0], [1], [0, 0, 1, 1], [], []>} : vector<8x25xbf16>, vector<25x400xbf16>, vector<8x400xf32> -> vector<8x400xf32>
    %8 = arith.addf %5, %7 : vector<8x400xf32>
    %c0_8 = arith.constant 0 : index
    %c0_9 = arith.constant 0 : index
    %9 = vector.load %arg5[%c0_8, %c0_9] : memref<1x400xf32, #tpu.memory_space<vmem>>, vector<1x400xf32>
    %10 = vector.broadcast %9 : vector<1x400xf32> to vector<8x400xf32>
    %11 = arith.addf %8, %10 : vector<8x400xf32>
    %cst_10 = arith.constant 0.000000e+00 : f32
    %12 = vector.broadcast %cst_10 : f32 to vector<8x400xf32>
    %13 = arith.maximumf %11, %12 : vector<8x400xf32>
    %14 = arith.truncf %13 : vector<8x400xf32> to vector<8x400xbf16>
    %c0_11 = arith.constant 0 : index
    %c0_12 = arith.constant 0 : index
    %15 = vector.load %arg6[%c0_11, %c0_12] : memref<400x400xbf16, #tpu.memory_space<vmem>>, vector<400x400xbf16>
    %cst_13 = arith.constant dense<0.000000e+00> : vector<8x400xf32>
    %16 = tpu.matmul %14, %15, %cst_13 {dimension_numbers = #tpu.dot_dimension_numbers<[1], [0], [0], [1], [0, 0, 1, 1], [], []>} : vector<8x400xbf16>, vector<400x400xbf16>, vector<8x400xf32> -> vector<8x400xf32>
    %c0_14 = arith.constant 0 : index
    %c0_15 = arith.constant 0 : index
    %17 = vector.load %arg7[%c0_14, %c0_15] : memref<1x400xf32, #tpu.memory_space<vmem>>, vector<1x400xf32>
    %18 = vector.broadcast %17 : vector<1x400xf32> to vector<8x400xf32>
    %19 = arith.addf %16, %18 : vector<8x400xf32>
    %cst_16 = arith.constant 0.000000e+00 : f32
    %20 = vector.broadcast %cst_16 : f32 to vector<8x400xf32>
    %21 = arith.maximumf %19, %20 : vector<8x400xf32>
    %22 = arith.truncf %21 : vector<8x400xf32> to vector<8x400xbf16>
    %c0_17 = arith.constant 0 : index
    %c0_18 = arith.constant 0 : index
    %23 = vector.load %arg8[%c0_17, %c0_18] : memref<400x128xbf16, #tpu.memory_space<vmem>>, vector<400x128xbf16>
    %cst_19 = arith.constant dense<0.000000e+00> : vector<8x128xf32>
    %24 = tpu.matmul %22, %23, %cst_19 {dimension_numbers = #tpu.dot_dimension_numbers<[1], [0], [0], [1], [0, 0, 1, 1], [], []>} : vector<8x400xbf16>, vector<400x128xbf16>, vector<8x128xf32> -> vector<8x128xf32>
    %c0_20 = arith.constant 0 : index
    %c0_21 = arith.constant 0 : index
    %25 = vector.load %arg9[%c0_20, %c0_21] : memref<1x128xf32, #tpu.memory_space<vmem>>, vector<1x128xf32>
    %26 = vector.broadcast %25 : vector<1x128xf32> to vector<8x128xf32>
    %27 = arith.addf %24, %26 : vector<8x128xf32>
    %c0_22 = arith.constant 0 : index
    %c0_23 = arith.constant 0 : index
    %28 = vector.load %arg10[%c0_22, %c0_23] : memref<8x128xf32, #tpu.memory_space<vmem>>, vector<8x128xf32>
    tpu.vector_store %arg10[%c0_22, %c0_23], %27 {strides = array<i32>} : memref<8x128xf32, #tpu.memory_space<vmem>>, vector<8x128xf32>,
    return
  }
  func.func @transform_0(%arg0: i32) -> (i32, i32) {
    %c0_i32 = arith.constant 0 : i32
    %c0_i32_0 = arith.constant 0 : i32
    return %arg0, %c0_i32 : i32, i32
  }
  func.func @transform_1(%arg0: i32) -> (i32, i32) {
    %c0_i32 = arith.constant 0 : i32
    %c0_i32_0 = arith.constant 0 : i32
    return %arg0, %c0_i32 : i32, i32
  }
  func.func @transform_2(%arg0: i32) -> (i32, i32) {
    %c0_i32 = arith.constant 0 : i32
    %c0_i32_0 = arith.constant 0 : i32
    %c0_i32_1 = arith.constant 0 : i32
    return %c0_i32, %c0_i32_0 : i32, i32
  }
  func.func @transform_3(%arg0: i32) -> (i32, i32) {
    %c0_i32 = arith.constant 0 : i32
    %c0_i32_0 = arith.constant 0 : i32
    %c0_i32_1 = arith.constant 0 : i32
    return %c0_i32, %c0_i32_0 : i32, i32
  }
  func.func @transform_4(%arg0: i32) -> (i32, i32) {
    %c0_i32 = arith.constant 0 : i32
    %c0_i32_0 = arith.constant 0 : i32
    %c0_i32_1 = arith.constant 0 : i32
    return %c0_i32, %c0_i32_0 : i32, i32
  }
  func.func @transform_5(%arg0: i32) -> (i32, i32) {
    %c0_i32 = arith.constant 0 : i32
    %c0_i32_0 = arith.constant 0 : i32
    %c0_i32_1 = arith.constant 0 : i32
    return %c0_i32, %c0_i32_0 : i32, i32
  }
  func.func @transform_6(%arg0: i32) -> (i32, i32) {
    %c0_i32 = arith.constant 0 : i32
    %c0_i32_0 = arith.constant 0 : i32
    %c0_i32_1 = arith.constant 0 : i32
    return %c0_i32, %c0_i32_0 : i32, i32
  }
  func.func @transform_7(%arg0: i32) -> (i32, i32) {
    %c0_i32 = arith.constant 0 : i32
    %c0_i32_0 = arith.constant 0 : i32
    %c0_i32_1 = arith.constant 0 : i32
    return %c0_i32, %c0_i32_0 : i32, i32
  }
  func.func @transform_8(%arg0: i32) -> (i32, i32) {
    %c0_i32 = arith.constant 0 : i32
    %c0_i32_0 = arith.constant 0 : i32
    %c0_i32_1 = arith.constant 0 : i32
    return %c0_i32, %c0_i32_0 : i32, i32
  }
  func.func @transform_9(%arg0: i32) -> (i32, i32) {
    %c0_i32 = arith.constant 0 : i32
    %c0_i32_0 = arith.constant 0 : i32
    return %arg0, %c0_i32 : i32, i32
  }
}

</mosaic_0001>

<bundles_post_ra>
// kernel: client_encoder_forward.1
= control target key start
LH: loop header
LB: loop body
LE: loop exit
PB: predicated region body
PF: predicated region fallthrough
CT: control target
= control target key end

     0   :  { %vm293_vm0 = vcmask 1043456   ;;  %vm294_vm1 = vcmask 1044480   ;;  %v3683_v1 = vmov 65535   ;;  %v3684_v3 = vmov 0   ;;  %s4850_s3 = inlined_call_operand.vmem [shape: bf16[25,400], index: 3, kind: input, shape index: {}]   ;;  %s4851_s1 = inlined_call_operand.vmem [shape: f32[8,25], index: 1, kind: input, shape index: {}]   ;;  %s4852_s2 = inlined_call_operand.vmem [shape: bf16[784,400], index: 2, kind: input, shape index: {}]   ;;  %s4853_s0 = inlined_call_operand.vmem [shape: f32[8,784], index: 0, kind: input, shape index: {}]   ;;  %s4854_s5 = inlined_call_operand.vmem [shape: bf16[400,400], index: 5, kind: input, shape index: {}]   ;;  %s4855_s7 = inlined_call_operand.vmem [shape: bf16[400,128], index: 7, kind: input, shape index: {}]   ;;  %s4856_s4 = inlined_call_operand.vmem [shape: f32[1,400], index: 4, kind: input, shape index: {}]   ;;  %s4857_s6 = inlined_call_operand.vmem [shape: f32[1,400], index: 6, kind: input, shape index: {}]   ;;  %s4858_s8 = inlined_call_operand.vmem [shape: f32[1,128], index: 8, kind: input, shape index: {}]   ;;  %s4859_s9 = inlined_call_operand.vmem [shape: f32[8,128], index: 9, kind: output, shape index: {}]  }
   0x1   :  { %v3202_v0 = vld [vmem:[%s4850_s3 + $0x4] ss:$16 sps:$4 sm:$0xff]   ;;  %v295_v2 = vsel %vm293_vm0, 4294967295, %v3683_v1  ;;  %341 = vmatprep.mubr.bf16.mxu0 %v3684_v3  ;;  %382 = vmatprep.mubr.bf16.mxu1 %v3684_v3  ;;  %v3204_v4 = vld [vmem:[%s4850_s3 + $0xc] ss:$16 sps:$4 sm:$0xff]   ;;  %vm289_vm2 = vcmask 203776  }
   0x2   :  { %309 = vmatprep.subr.bf16.mxu0 %v3202_v0  ;;  %v3206_v5 = vld [vmem:[%s4850_s3] ss:$16 sps:$4 sm:$0xff]   ;;  %v3207_v6 = vld [vmem:[%s4850_s3 + $0x8] ss:$16 sps:$4 sm:$0xff]   ;;  %v296_v7 = vsel %vm294_vm1, %v295_v2, 0  ;;  %350 = vmatprep.subr.bf16.mxu1 %v3204_v4  ;;  %vm1371_vm3 = vcmask 130048  }
   0x3   :  { %v3208_v8 = vld [vmem:[%s4850_s3 + $0x24] ss:$16 sps:$4 sm:$0x1f]   ;;  %310 = vmatpush1.bf16.msra.mxu0 %v3206_v5  ;;  %351 = vmatpush1.bf16.msra.mxu1 %v3207_v6  ;;  %v3210_v9 = vld [vmem:[%s4850_s3 + $0x2c] ss:$16 sps:$4 sm:$0x1f]  }
   0x4   :  { %v47_v10 = vld [vmem:[%s4851_s1] sm:$0xff]  ;;  %v301_v11 = vand.u32 %v3208_v8, %v296_v7  ;;  %v3213_v13 = vld [vmem:[%s4850_s3 + $0x28] ss:$16 sps:$4 sm:$0x1f]   ;;  %v307_v14 = vand.u32 %v3210_v9, %v296_v7 }
   0x5   :  { %v3212_v12 = vld [vmem:[%s4850_s3 + $0x20] ss:$16 sps:$4 sm:$0x1f]   ;;  %v304_v16 = vand.u32 %v3213_v13, %v296_v7  ;;  %v3216_v17 = vld [vmem:[%s4852_s2 + $0x4] ss:$16 sps:$4 sm:$0xff]   ;;  %v48_v18 = vpack.c.bf16 %v47_v10, %v47_v10  ;;  %v34_v61 = vld [vmem:[%s4853_s0 + $0x8] sm:$0xff] }
   0x6   :  { %311 = vmatprep.subr.bf16.mxu0 %v301_v11  ;;  %v298_v15 = vand.u32 %v3212_v12, %v296_v7  ;;  %352 = vmatprep.subr.bf16.mxu1 %v307_v14  ;;  %v3219_v19 = vld [vmem:[%s4852_s2 + $0x204] ss:$16 sps:$4 sm:$0xff]   ;;  %v3214_v20 = vld [vmem:[%s4852_s2] ss:$16 sps:$4 sm:$0xff]   ;;  %v3902_v0 = vpack.c.bf16 %v34_v61, %v34_v61  ;;  %v36_v1 = vld [vmem:[%s4853_s0 + $0x18] sm:$0xff] }
   0x7   :  { %353 = vmatpush1.bf16.msra.mxu1 %v304_v16  ;;  %v3217_v21 = vld [vmem:[%s4852_s2 + $0x200] ss:$16 sps:$4 sm:$0xff]   ;;  %v3222_v22 = vld [vmem:[%s4852_s2 + $0x24] ss:$16 sps:$4 sm:$0xff]   ;;  %v3910_v4 = vpack.c.bf16 %v36_v1, %v36_v1  ;;  %v3357_v61 = vld [vmem:[%s4852_s2 + $0xcc] ss:$16 sps:$4 sm:$0xff]  }
   0x8   :  { %312 = vmatpush1.bf16.msra.mxu0 %v298_v15  ;;  %1416 = vmatprep.subr.bf16.mxu1 %v3219_v19  ;;  %v3225_v23 = vld [vmem:[%s4852_s2 + $0x224] ss:$16 sps:$4 sm:$0xff]   ;;  %v3220_v24 = vld [vmem:[%s4852_s2 + $0x20] ss:$16 sps:$4 sm:$0xff]   ;;  %v3363_v1 = vld [vmem:[%s4852_s2 + $0xec] ss:$16 sps:$4 sm:$0xff]  }
   0x9   :  { %1375 = vmatprep.subr.bf16.mxu0 %v3216_v17  ;;  %v3223_v25 = vld [vmem:[%s4852_s2 + $0x220] ss:$16 sps:$4 sm:$0xff]   ;;  %v3228_v26 = vld [vmem:[%s4852_s2 + $0x44] ss:$16 sps:$4 sm:$0xff]  }
   0xa   :  { %2838 = vmatmul.mubr.msk.bf16.vlgmr.msra.gmra.mrb[0].mxu1 %vm289_vm2, %v48_v18  ;;  %v3231_v27 = vld [vmem:[%s4852_s2 + $0x244] ss:$16 sps:$4 sm:$0xff]   ;;  %v3226_v28 = vld [vmem:[%s4852_s2 + $0x40] ss:$16 sps:$4 sm:$0xff]  }
   0xb   :  { %2837 = vmatmul.mubr.msk.bf16.vlgmr.msra.gmra.mrb[0].mxu0 %vm289_vm2, %v48_v18  ;;  %1417 = vmatpush1.bf16.msra.mxu1 %v3217_v21  ;;  %v3229_v29 = vld [vmem:[%s4852_s2 + $0x240] ss:$16 sps:$4 sm:$0xff]   ;;  %v3234_v30 = vld [vmem:[%s4852_s2 + $0x64] ss:$16 sps:$4 sm:$0xff]  }
   0xc   :  { %1376 = vmatpush1.bf16.msra.mxu0 %v3214_v20  ;;  %1418 = vmatprep.subr.bf16.mxu1 %v3225_v23  ;;  %v3237_v31 = vld [vmem:[%s4852_s2 + $0x264] ss:$16 sps:$4 sm:$0xff]   ;;  %v3232_v32 = vld [vmem:[%s4852_s2 + $0x60] ss:$16 sps:$4 sm:$0xff]  }
   0xd   :  { %1377 = vmatprep.subr.bf16.mxu0 %v3222_v22  ;;  %v3235_v33 = vld [vmem:[%s4852_s2 + $0x260] ss:$16 sps:$4 sm:$0xff]   ;;  %v3240_v34 = vld [vmem:[%s4852_s2 + $0x84] ss:$16 sps:$4 sm:$0xff]   ;;  %1407 = vmatprep.mubr.bf16.mxu0 %v3902_v0 }
   0xe   :  { %v3243_v35 = vld [vmem:[%s4852_s2 + $0x284] ss:$16 sps:$4 sm:$0xff]   ;;  %v3238_v36 = vld [vmem:[%s4852_s2 + $0x80] ss:$16 sps:$4 sm:$0xff]   ;;  %1448 = vmatprep.mubr.bf16.mxu1 %v3910_v4 }
   0xf   :  { %1419 = vmatpush1.bf16.msra.mxu1 %v3223_v25  ;;  %v3241_v37 = vld [vmem:[%s4852_s2 + $0x280] ss:$16 sps:$4 sm:$0xff]   ;;  %v3246_v38 = vld [vmem:[%s4852_s2 + $0xa4] ss:$16 sps:$4 sm:$0xff]  }
  0x10   :  { %1378 = vmatpush1.bf16.msra.mxu0 %v3220_v24  ;;  %1420 = vmatprep.subr.bf16.mxu1 %v3231_v27  ;;  %v3249_v39 = vld [vmem:[%s4852_s2 + $0x2a4] ss:$16 sps:$4 sm:$0xff]   ;;  %v3244_v40 = vld [vmem:[%s4852_s2 + $0xa0] ss:$16 sps:$4 sm:$0xff]  }
  0x11   :  { %1379 = vmatprep.subr.bf16.mxu0 %v3228_v26  ;;  %v3247_v41 = vld [vmem:[%s4852_s2 + $0x2a0] ss:$16 sps:$4 sm:$0xff]   ;;  %v3252_v42 = vld [vmem:[%s4852_s2 + $0xc4] ss:$16 sps:$4 sm:$0xff]  }
  0x12   :  { %v3255_v43 = vld [vmem:[%s4852_s2 + $0x2c4] ss:$16 sps:$4 sm:$0xff]   ;;  %v3250_v44 = vld [vmem:[%s4852_s2 + $0xc0] ss:$16 sps:$4 sm:$0xff]  }
  0x13   :  { %1421 = vmatpush1.bf16.msra.mxu1 %v3229_v29  ;;  %v3253_v45 = vld [vmem:[%s4852_s2 + $0x2c0] ss:$16 sps:$4 sm:$0xff]   ;;  %v3258_v46 = vld [vmem:[%s4852_s2 + $0xe4] ss:$16 sps:$4 sm:$0xff]  }
  0x14   :  { %1380 = vmatpush1.bf16.msra.mxu0 %v3226_v28  ;;  %1422 = vmatprep.subr.bf16.mxu1 %v3237_v31  ;;  %v3261_v47 = vld [vmem:[%s4852_s2 + $0x2e4] ss:$16 sps:$4 sm:$0xff]   ;;  %v3256_v48 = vld [vmem:[%s4852_s2 + $0xe0] ss:$16 sps:$4 sm:$0xff]  }
  0x15   :  { %1381 = vmatprep.subr.bf16.mxu0 %v3234_v30  ;;  %v3259_v49 = vld [vmem:[%s4852_s2 + $0x2e0] ss:$16 sps:$4 sm:$0xff]   ;;  %v3264_v50 = vld [vmem:[%s4852_s2 + $0x104] ss:$16 sps:$4 sm:$0xff]  }
  0x16   :  { %v3267_v51 = vld [vmem:[%s4852_s2 + $0x304] ss:$16 sps:$4 sm:$0xff]   ;;  %v3262_v52 = vld [vmem:[%s4852_s2 + $0x100] ss:$16 sps:$4 sm:$0xff]  }
  0x17   :  { %1423 = vmatpush1.bf16.msra.mxu1 %v3235_v33  ;;  %v3265_v53 = vld [vmem:[%s4852_s2 + $0x300] ss:$16 sps:$4 sm:$0xff]   ;;  %v3270_v54 = vld [vmem:[%s4852_s2 + $0x124] ss:$16 sps:$4 sm:$0xff]  }
  0x18   :  { %1382 = vmatpush1.bf16.msra.mxu0 %v3232_v32  ;;  %1424 = vmatprep.subr.bf16.mxu1 %v3243_v35  ;;  %v3273_v55 = vld [vmem:[%s4852_s2 + $0x324] ss:$16 sps:$4 sm:$0xff]   ;;  %v3268_v56 = vld [vmem:[%s4852_s2 + $0x120] ss:$16 sps:$4 sm:$0xff]   ;;  %v3321_v32 = vld [vmem:[%s4852_s2 + $0xc] ss:$16 sps:$4 sm:$0xff]  }
  0x19   :  { %1383 = vmatprep.subr.bf16.mxu0 %v3240_v34  ;;  %v3271_v57 = vld [vmem:[%s4852_s2 + $0x320] ss:$16 sps:$4 sm:$0xff]   ;;  %v3276_v58 = vld [vmem:[%s4852_s2 + $0x144] ss:$16 sps:$4 sm:$0xff]  }
  0x1a   :  { %v3279_v59 = vld [vmem:[%s4852_s2 + $0x344] ss:$16 sps:$4 sm:$0xff]   ;;  %v3274_v60 = vld [vmem:[%s4852_s2 + $0x140] ss:$16 sps:$4 sm:$0xff]  }
  0x1b   :  { %1425 = vmatpush1.bf16.msra.mxu1 %v3241_v37  ;;  %v3277_v62 = vld [vmem:[%s4852_s2 + $0x340] ss:$16 sps:$4 sm:$0xff]   ;;  %v3282_v63 = vld [vmem:[%s4852_s2 + $0x164] ss:$16 sps:$4 sm:$0xff]  }
  0x1c   :  { %1384 = vmatpush1.bf16.msra.mxu0 %v3238_v36  ;;  %1426 = vmatprep.subr.bf16.mxu1 %v3249_v39  ;;  %v3285_v2 = vld [vmem:[%s4852_s2 + $0x364] ss:$16 sps:$4 sm:$0xff]   ;;  %v3280_v5 = vld [vmem:[%s4852_s2 + $0x160] ss:$16 sps:$4 sm:$0xff]   ;;  %v3319_v36 = vld [vmem:[%s4852_s2 + $0x8] ss:$16 sps:$4 sm:$0xff]  }
  0x1d   :  { %1385 = vmatprep.subr.bf16.mxu0 %v3246_v38  ;;  %v3283_v6 = vld [vmem:[%s4852_s2 + $0x360] ss:$16 sps:$4 sm:$0xff]   ;;  %v3288_v7 = vld [vmem:[%s4852_s2 + $0x184] ss:$16 sps:$4 sm:$0xff]   ;;  %v3327_v39 = vld [vmem:[%s4852_s2 + $0x2c] ss:$16 sps:$4 sm:$0xff]  }
  0x1e   :  { %v3291_v8 = vld [vmem:[%s4852_s2 + $0x384] ss:$16 sps:$4 sm:$0xff]   ;;  %v3286_v9 = vld [vmem:[%s4852_s2 + $0x180] ss:$16 sps:$4 sm:$0xff]  }
  0x1f   :  { %1427 = vmatpush1.bf16.msra.mxu1 %v3247_v41  ;;  %v3289_v10 = vld [vmem:[%s4852_s2 + $0x380] ss:$16 sps:$4 sm:$0xff]   ;;  %v3294_v11 = vld [vmem:[%s4852_s2 + $0x1a4] ss:$16 sps:$4 sm:$0xff]   ;;  %v3325_v41 = vld [vmem:[%s4852_s2 + $0x28] ss:$16 sps:$4 sm:$0xff]  }
  0x20   :  { %1386 = vmatpush1.bf16.msra.mxu0 %v3244_v40  ;;  %1428 = vmatprep.subr.bf16.mxu1 %v3255_v43  ;;  %v3297_v12 = vld [vmem:[%s4852_s2 + $0x3a4] ss:$16 sps:$4 sm:$0xff]   ;;  %v3292_v13 = vld [vmem:[%s4852_s2 + $0x1a0] ss:$16 sps:$4 sm:$0xff]   ;;  %v3333_v43 = vld [vmem:[%s4852_s2 + $0x4c] ss:$16 sps:$4 sm:$0xff]  }
  0x21   :  { %1387 = vmatprep.subr.bf16.mxu0 %v3252_v42  ;;  %v3295_v14 = vld [vmem:[%s4852_s2 + $0x3a0] ss:$16 sps:$4 sm:$0xff]   ;;  %v3300_v15 = vld [vmem:[%s4852_s2 + $0x1c4] ss:$16 sps:$4 sm:$0xff]  }
  0x22   :  { %v3303_v16 = vld [vmem:[%s4852_s2 + $0x3c4] ss:$16 sps:$4 sm:$0xff]   ;;  %v3298_v17 = vld [vmem:[%s4852_s2 + $0x1c0] ss:$16 sps:$4 sm:$0xff]  }
  0x23   :  { %1429 = vmatpush1.bf16.msra.mxu1 %v3253_v45  ;;  %v3301_v18 = vld [vmem:[%s4852_s2 + $0x3c0] ss:$16 sps:$4 sm:$0xff]   ;;  %v3306_v19 = vld [vmem:[%s4852_s2 + $0x1e4] ss:$16 sps:$4 sm:$0xff]   ;;  %v3331_v45 = vld [vmem:[%s4852_s2 + $0x48] ss:$16 sps:$4 sm:$0xff]  }
  0x24   :  { %1388 = vmatpush1.bf16.msra.mxu0 %v3250_v44  ;;  %1430 = vmatprep.subr.bf16.mxu1 %v3261_v47  ;;  %v3309_v20 = vld [vmem:[%s4852_s2 + $0x3e4] ss:$16 sps:$4 sm:$0xff]   ;;  %v3304_v21 = vld [vmem:[%s4852_s2 + $0x1e0] ss:$16 sps:$4 sm:$0xff]   ;;  %v3339_v47 = vld [vmem:[%s4852_s2 + $0x6c] ss:$16 sps:$4 sm:$0xff]  }
  0x25   :  { %1389 = vmatprep.subr.bf16.mxu0 %v3258_v46  ;;  %v3307_v22 = vld [vmem:[%s4852_s2 + $0x3e0] ss:$16 sps:$4 sm:$0xff]   ;;  %v3312_v25 = vld [vmem:[%s4852_s2 + $0x404] ss:$16 sps:$4 sm:$0xff]  }
  0x26   :  { %v33_v23 = vld [vmem:[%s4853_s0] sm:$0xff]  ;;  %v35_v24 = vld [vmem:[%s4853_s0 + $0x10] sm:$0xff] }
  0x27   :  { %1431 = vmatpush1.bf16.msra.mxu1 %v3259_v49  ;;  %v3315_v26 = vld [vmem:[%s4852_s2 + $0x604] ss:$16 sps:$4 sm:$0xff]   ;;  %v3980_v27 = vpack.c.bf16 %v33_v23, %v33_v23  ;;  %v3982_v28 = vpack.c.bf16 %v35_v24, %v35_v24  ;;  %v3310_v29 = vld [vmem:[%s4852_s2 + $0x400] ss:$16 sps:$4 sm:$0xff]   ;;  %v38_v49 = vld [vmem:[%s4853_s0 + $0x28] sm:$0xff] }
  0x28   :  { %1390 = vmatpush1.bf16.msra.mxu0 %v3256_v48  ;;  %1432 = vmatprep.subr.bf16.mxu1 %v3267_v51  ;;  %v3313_v30 = vld [vmem:[%s4852_s2 + $0x600] ss:$16 sps:$4 sm:$0xff]   ;;  %v3318_v31 = vld [vmem:[%s4852_s2 + $0x424] ss:$16 sps:$4 sm:$0xff]   ;;  %v3337_v51 = vld [vmem:[%s4852_s2 + $0x68] ss:$16 sps:$4 sm:$0xff]  }
  0x29   :  { %1391 = vmatprep.subr.bf16.mxu0 %v3264_v50  ;;  %v3316_v33 = vld [vmem:[%s4852_s2 + $0x420] ss:$16 sps:$4 sm:$0xff]   ;;  %v3324_v35 = vld [vmem:[%s4852_s2 + $0x444] ss:$16 sps:$4 sm:$0xff]   ;;  %v4052_v50 = vpack.c.bf16 %v38_v49, %v38_v49  ;;  %v3393_v23 = vld [vmem:[%s4852_s2 + $0x18c] ss:$16 sps:$4 sm:$0xff]  }
  0x2a   :  { %v39_v34 = vld [vmem:[%s4853_s0 + $0x30] sm:$0xff]  ;;  %v3421_v49 = vld [vmem:[%s4852_s2 + $0x428] ss:$16 sps:$4 sm:$0xff]  }
  0x2b   :  { %1433 = vmatpush1.bf16.msra.mxu1 %v3265_v53  ;;  %v3322_v37 = vld [vmem:[%s4852_s2 + $0x440] ss:$16 sps:$4 sm:$0xff]   ;;  %v4014_v38 = vpack.c.bf16 %v39_v34, %v39_v34  ;;  %v3330_v40 = vld [vmem:[%s4852_s2 + $0x464] ss:$16 sps:$4 sm:$0xff]   ;;  %v3345_v53 = vld [vmem:[%s4852_s2 + $0x8c] ss:$16 sps:$4 sm:$0xff]  }
  0x2c   :  { %1392 = vmatpush1.bf16.msra.mxu0 %v3262_v52  ;;  %1434 = vmatprep.subr.bf16.mxu1 %v3273_v55  ;;  %v3328_v42 = vld [vmem:[%s4852_s2 + $0x460] ss:$16 sps:$4 sm:$0xff]   ;;  %v3336_v44 = vld [vmem:[%s4852_s2 + $0x484] ss:$16 sps:$4 sm:$0xff]   ;;  %v3343_v55 = vld [vmem:[%s4852_s2 + $0x88] ss:$16 sps:$4 sm:$0xff]  }
  0x2d   :  { %1393 = vmatprep.subr.bf16.mxu0 %v3270_v54  ;;  %v3334_v46 = vld [vmem:[%s4852_s2 + $0x480] ss:$16 sps:$4 sm:$0xff]   ;;  %v3342_v48 = vld [vmem:[%s4852_s2 + $0x4a4] ss:$16 sps:$4 sm:$0xff]   ;;  %v3405_v34 = vld [vmem:[%s4852_s2 + $0x1cc] ss:$16 sps:$4 sm:$0xff]  }
  0x2e   :  { %v3340_v52 = vld [vmem:[%s4852_s2 + $0x4a0] ss:$16 sps:$4 sm:$0xff]   ;;  %v3348_v54 = vld [vmem:[%s4852_s2 + $0x4c4] ss:$16 sps:$4 sm:$0xff]  }
  0x2f   :  { %1435 = vmatpush1.bf16.msra.mxu1 %v3271_v57  ;;  %v3351_v57 = vld [vmem:[%s4852_s2 + $0xac] ss:$16 sps:$4 sm:$0xff]   ;;  %v3396_v24 = vld [vmem:[%s4852_s2 + $0x5c4] ss:$16 sps:$4 sm:$0xff]  }
  0x30   :  { %1394 = vmatpush1.bf16.msra.mxu0 %v3268_v56  ;;  %1436 = vmatprep.subr.bf16.mxu1 %v3279_v59  ;;  %v3346_v56 = vld [vmem:[%s4852_s2 + $0x4c0] ss:$16 sps:$4 sm:$0xff]   ;;  %v3349_v59 = vld [vmem:[%s4852_s2 + $0xa8] ss:$16 sps:$4 sm:$0xff]  }
  0x31   :  { %1395 = vmatprep.subr.bf16.mxu0 %v3276_v58  ;;  %v3354_v58 = vld [vmem:[%s4852_s2 + $0x4e4] ss:$16 sps:$4 sm:$0xff]  }
  0x33   :  { %1437 = vmatpush1.bf16.msra.mxu1 %v3277_v62  ;;  %v3360_v62 = vld [vmem:[%s4852_s2 + $0x504] ss:$16 sps:$4 sm:$0xff]  }
  0x34   :  { %1396 = vmatpush1.bf16.msra.mxu0 %v3274_v60  ;;  %1438 = vmatprep.subr.bf16.mxu1 %v3285_v2  ;;  %v3352_v60 = vld [vmem:[%s4852_s2 + $0x4e0] ss:$16 sps:$4 sm:$0xff]   ;;  %v3366_v2 = vld [vmem:[%s4852_s2 + $0x524] ss:$16 sps:$4 sm:$0xff]  }
  0x35   :  { %1397 = vmatprep.subr.bf16.mxu0 %v3282_v63  ;;  %v3355_v63 = vld [vmem:[%s4852_s2 + $0xc8] ss:$16 sps:$4 sm:$0xff]  }
  0x37   :  { %1439 = vmatpush1.bf16.msra.mxu1 %v3283_v6  ;;  %v3364_v6 = vld [vmem:[%s4852_s2 + $0x520] ss:$16 sps:$4 sm:$0xff]  }
  0x38   :  { %1398 = vmatpush1.bf16.msra.mxu0 %v3280_v5  ;;  %1440 = vmatprep.subr.bf16.mxu1 %v3291_v8  ;;  %v3361_v5 = vld [vmem:[%s4852_s2 + $0xe8] ss:$16 sps:$4 sm:$0xff]   ;;  %v3372_v8 = vld [vmem:[%s4852_s2 + $0x544] ss:$16 sps:$4 sm:$0xff]  }
  0x39   :  { %1399 = vmatprep.subr.bf16.mxu0 %v3288_v7  ;;  %v3369_v7 = vld [vmem:[%s4852_s2 + $0x10c] ss:$16 sps:$4 sm:$0xff]  }
  0x3b   :  { %1441 = vmatpush1.bf16.msra.mxu1 %v3289_v10  ;;  %v3370_v10 = vld [vmem:[%s4852_s2 + $0x540] ss:$16 sps:$4 sm:$0xff]  }
  0x3c   :  { %1400 = vmatpush1.bf16.msra.mxu0 %v3286_v9  ;;  %1442 = vmatprep.subr.bf16.mxu1 %v3297_v12  ;;  %v3367_v9 = vld [vmem:[%s4852_s2 + $0x108] ss:$16 sps:$4 sm:$0xff]   ;;  %v3378_v12 = vld [vmem:[%s4852_s2 + $0x564] ss:$16 sps:$4 sm:$0xff]  }
  0x3d   :  { %1401 = vmatprep.subr.bf16.mxu0 %v3294_v11  ;;  %v3375_v11 = vld [vmem:[%s4852_s2 + $0x12c] ss:$16 sps:$4 sm:$0xff]  }
  0x3f   :  { %1443 = vmatpush1.bf16.msra.mxu1 %v3295_v14  ;;  %v3376_v14 = vld [vmem:[%s4852_s2 + $0x560] ss:$16 sps:$4 sm:$0xff]  }
  0x40   :  { %1402 = vmatpush1.bf16.msra.mxu0 %v3292_v13  ;;  %1444 = vmatprep.subr.bf16.mxu1 %v3303_v16  ;;  %v3373_v13 = vld [vmem:[%s4852_s2 + $0x128] ss:$16 sps:$4 sm:$0xff]   ;;  %v3384_v16 = vld [vmem:[%s4852_s2 + $0x584] ss:$16 sps:$4 sm:$0xff]  }
  0x41   :  { %1403 = vmatprep.subr.bf16.mxu0 %v3300_v15  ;;  %v3381_v15 = vld [vmem:[%s4852_s2 + $0x14c] ss:$16 sps:$4 sm:$0xff]  }
  0x43   :  { %1445 = vmatpush1.bf16.msra.mxu1 %v3301_v18  ;;  %v3382_v18 = vld [vmem:[%s4852_s2 + $0x580] ss:$16 sps:$4 sm:$0xff]  }
  0x44   :  { %1404 = vmatpush1.bf16.msra.mxu0 %v3298_v17  ;;  %1446 = vmatprep.subr.bf16.mxu1 %v3309_v20  ;;  %v3379_v17 = vld [vmem:[%s4852_s2 + $0x148] ss:$16 sps:$4 sm:$0xff]   ;;  %v3390_v20 = vld [vmem:[%s4852_s2 + $0x5a4] ss:$16 sps:$4 sm:$0xff]  }
  0x45   :  { %1405 = vmatprep.subr.bf16.mxu0 %v3306_v19  ;;  %v3387_v19 = vld [vmem:[%s4852_s2 + $0x16c] ss:$16 sps:$4 sm:$0xff]  }
  0x47   :  { %1447 = vmatpush1.bf16.msra.mxu1 %v3307_v22  ;;  %v3388_v22 = vld [vmem:[%s4852_s2 + $0x5a0] ss:$16 sps:$4 sm:$0xff]  }
  0x48   :  { %1406 = vmatpush1.bf16.msra.mxu0 %v3304_v21  ;;  %1498 = vmatprep.subr.bf16.mxu1 %v3315_v26  ;;  %v3385_v21 = vld [vmem:[%s4852_s2 + $0x168] ss:$16 sps:$4 sm:$0xff]   ;;  %v3394_v26 = vld [vmem:[%s4852_s2 + $0x5c0] ss:$16 sps:$4 sm:$0xff]  }
  0x49   :  { %1457 = vmatprep.subr.bf16.mxu0 %v3312_v25  ;;  %v3391_v25 = vld [vmem:[%s4852_s2 + $0x188] ss:$16 sps:$4 sm:$0xff]  }
  0x4a   :  { %1449 = vmatmul.mubr.bf16.vlgmr.msra.gmra.mrb[4].mxu1 %v3982_v28 }
  0x4b   :  { %1408 = vmatmul.mubr.bf16.vlgmr.msra.gmra.mrb[4].mxu0 %v3980_v27  ;;  %1499 = vmatpush1.bf16.msra.mxu1 %v3313_v30  ;;  %v3402_v30 = vld [vmem:[%s4852_s2 + $0x5e4] ss:$16 sps:$4 sm:$0xff]  }
  0x4c   :  { %1458 = vmatpush1.bf16.msra.mxu0 %v3310_v29  ;;  %1530 = vmatprep.mubr.bf16.mxu1 %v3684_v3  ;;  %v3399_v29 = vld [vmem:[%s4852_s2 + $0x1ac] ss:$16 sps:$4 sm:$0xff]  }
  0x4d   :  { %1459 = vmatprep.subr.bf16.mxu0 %v3318_v31  ;;  %1539 = vmatprep.subr.bf16.mxu1 %v3321_v32  ;;  %v3397_v31 = vld [vmem:[%s4852_s2 + $0x1a8] ss:$16 sps:$4 sm:$0xff]   ;;  %v3400_v32 = vld [vmem:[%s4852_s2 + $0x5e0] ss:$16 sps:$4 sm:$0xff]  }
  0x4e   :  { %1489 = vmatprep.mubr.bf16.mxu0 %v4052_v50 }
  0x50   :  { %1460 = vmatpush1.bf16.msra.mxu0 %v3316_v33  ;;  %v37_v33 = vld [vmem:[%s4853_s0 + $0x20] sm:$0xff] }
  0x51   :  { %1461 = vmatprep.subr.bf16.mxu0 %v3324_v35  ;;  %v3408_v35 = vld [vmem:[%s4852_s2 + $0x20c] ss:$16 sps:$4 sm:$0xff]  }
  0x52   :  { %3035 = vmatmul.mubr.msk.bf16.vlgmr.msra.gmra.mrb[8].mxu1 %vm1371_vm3, %v4014_v38 }
  0x53   :  { %1540 = vmatpush1.bf16.msra.mxu1 %v3319_v36  ;;  %1571 = vmatprep.mubr.bf16.mxu1 %v3902_v0  ;;  %v3358_v0 = vld [vmem:[%s4852_s2 + $0x500] ss:$16 sps:$4 sm:$0xff]   ;;  %v4190_v36 = vpack.c.bf16 %v37_v33, %v37_v33  ;;  %v3490_v33 = vld [vmem:[%s4852_s2 + $0x3c8] ss:$16 sps:$4 sm:$0xff]  }
  0x54   :  { %1462 = vmatpush1.bf16.msra.mxu0 %v3322_v37  ;;  %1541 = vmatprep.subr.bf16.mxu1 %v3327_v39  ;;  %v3403_v37 = vld [vmem:[%s4852_s2 + $0x1c8] ss:$16 sps:$4 sm:$0xff]  }
  0x55   :  { %1463 = vmatprep.subr.bf16.mxu0 %v3330_v40  ;;  %v3406_v39 = vld [vmem:[%s4852_s2 + $0x208] ss:$16 sps:$4 sm:$0xff]   ;;  %v3411_v40 = vld [vmem:[%s4852_s2 + $0x1ec] ss:$16 sps:$4 sm:$0xff]  }
  0x57   :  { %1542 = vmatpush1.bf16.msra.mxu1 %v3325_v41  ;;  %v3414_v41 = vld [vmem:[%s4852_s2 + $0x22c] ss:$16 sps:$4 sm:$0xff]  }
  0x58   :  { %1464 = vmatpush1.bf16.msra.mxu0 %v3328_v42  ;;  %1543 = vmatprep.subr.bf16.mxu1 %v3333_v43  ;;  %v3409_v42 = vld [vmem:[%s4852_s2 + $0x1e8] ss:$16 sps:$4 sm:$0xff]  }
  0x59   :  { %1465 = vmatprep.subr.bf16.mxu0 %v3336_v44  ;;  %v3412_v43 = vld [vmem:[%s4852_s2 + $0x228] ss:$16 sps:$4 sm:$0xff]   ;;  %v3417_v44 = vld [vmem:[%s4852_s2 + $0x40c] ss:$16 sps:$4 sm:$0xff]  }
  0x5b   :  { %1544 = vmatpush1.bf16.msra.mxu1 %v3331_v45  ;;  %v3420_v45 = vld [vmem:[%s4852_s2 + $0x24c] ss:$16 sps:$4 sm:$0xff]  }
  0x5c   :  { %1466 = vmatpush1.bf16.msra.mxu0 %v3334_v46  ;;  %1545 = vmatprep.subr.bf16.mxu1 %v3339_v47  ;;  %v3415_v46 = vld [vmem:[%s4852_s2 + $0x408] ss:$16 sps:$4 sm:$0xff]  }
  0x5d   :  { %1467 = vmatprep.subr.bf16.mxu0 %v3342_v48  ;;  %v3418_v47 = vld [vmem:[%s4852_s2 + $0x248] ss:$16 sps:$4 sm:$0xff]   ;;  %v3423_v48 = vld [vmem:[%s4852_s2 + $0x42c] ss:$16 sps:$4 sm:$0xff]  }
  0x5f   :  { %1546 = vmatpush1.bf16.msra.mxu1 %v3337_v51  ;;  %v3424_v51 = vld [vmem:[%s4852_s2 + $0x268] ss:$16 sps:$4 sm:$0xff]  }
  0x60   :  { %1468 = vmatpush1.bf16.msra.mxu0 %v3340_v52  ;;  %1547 = vmatprep.subr.bf16.mxu1 %v3345_v53  ;;  %v3429_v52 = vld [vmem:[%s4852_s2 + $0x44c] ss:$16 sps:$4 sm:$0xff]   ;;  %v3427_v53 = vld [vmem:[%s4852_s2 + $0x448] ss:$16 sps:$4 sm:$0xff]  }
  0x61   :  { %1469 = vmatprep.subr.bf16.mxu0 %v3348_v54  ;;  %v3430_v54 = vld [vmem:[%s4852_s2 + $0x288] ss:$16 sps:$4 sm:$0xff]  }
  0x63   :  { %1548 = vmatpush1.bf16.msra.mxu1 %v3343_v55  ;;  %v3435_v55 = vld [vmem:[%s4852_s2 + $0x46c] ss:$16 sps:$4 sm:$0xff]  }
  0x64   :  { %1470 = vmatpush1.bf16.msra.mxu0 %v3346_v56  ;;  %1549 = vmatprep.subr.bf16.mxu1 %v3351_v57  ;;  %v3433_v56 = vld [vmem:[%s4852_s2 + $0x468] ss:$16 sps:$4 sm:$0xff]  }
  0x65   :  { %1471 = vmatprep.subr.bf16.mxu0 %v3354_v58  ;;  %v3436_v57 = vld [vmem:[%s4852_s2 + $0x2a8] ss:$16 sps:$4 sm:$0xff]   ;;  %v3441_v58 = vld [vmem:[%s4852_s2 + $0x48c] ss:$16 sps:$4 sm:$0xff]  }
  0x67   :  { %1550 = vmatpush1.bf16.msra.mxu1 %v3349_v59  ;;  %v3444_v59 = vld [vmem:[%s4852_s2 + $0x2cc] ss:$16 sps:$4 sm:$0xff]  }
  0x68   :  { %1472 = vmatpush1.bf16.msra.mxu0 %v3352_v60  ;;  %1551 = vmatprep.subr.bf16.mxu1 %v3357_v61  ;;  %v3439_v60 = vld [vmem:[%s4852_s2 + $0x488] ss:$16 sps:$4 sm:$0xff]  }
  0x69   :  { %1473 = vmatprep.subr.bf16.mxu0 %v3360_v62  ;;  %v3442_v61 = vld [vmem:[%s4852_s2 + $0x2c8] ss:$16 sps:$4 sm:$0xff]   ;;  %v3447_v62 = vld [vmem:[%s4852_s2 + $0x4ac] ss:$16 sps:$4 sm:$0xff]  }
  0x6b   :  { %1552 = vmatpush1.bf16.msra.mxu1 %v3355_v63  ;;  %v3450_v63 = vld [vmem:[%s4852_s2 + $0x2ec] ss:$16 sps:$4 sm:$0xff]  }
  0x6c   :  { %1474 = vmatpush1.bf16.msra.mxu0 %v3358_v0  ;;  %1553 = vmatprep.subr.bf16.mxu1 %v3363_v1  ;;  %v3445_v0 = vld [vmem:[%s4852_s2 + $0x4a8] ss:$16 sps:$4 sm:$0xff]  }
  0x6d   :  { %1475 = vmatprep.subr.bf16.mxu0 %v3366_v2  ;;  %v3448_v1 = vld [vmem:[%s4852_s2 + $0x2e8] ss:$16 sps:$4 sm:$0xff]   ;;  %v3453_v2 = vld [vmem:[%s4852_s2 + $0x4cc] ss:$16 sps:$4 sm:$0xff]  }
  0x6f   :  { %1554 = vmatpush1.bf16.msra.mxu1 %v3361_v5  ;;  %v3456_v5 = vld [vmem:[%s4852_s2 + $0x30c] ss:$16 sps:$4 sm:$0xff]  }
  0x70   :  { %1476 = vmatpush1.bf16.msra.mxu0 %v3364_v6  ;;  %1555 = vmatprep.subr.bf16.mxu1 %v3369_v7  ;;  %v3451_v6 = vld [vmem:[%s4852_s2 + $0x4c8] ss:$16 sps:$4 sm:$0xff]  }
  0x71   :  { %1477 = vmatprep.subr.bf16.mxu0 %v3372_v8  ;;  %v3454_v7 = vld [vmem:[%s4852_s2 + $0x308] ss:$16 sps:$4 sm:$0xff]   ;;  %v3459_v8 = vld [vmem:[%s4852_s2 + $0x4ec] ss:$16 sps:$4 sm:$0xff]  }
  0x73   :  { %1556 = vmatpush1.bf16.msra.mxu1 %v3367_v9  ;;  %v3462_v9 = vld [vmem:[%s4852_s2 + $0x32c] ss:$16 sps:$4 sm:$0xff]  }
  0x74   :  { %1478 = vmatpush1.bf16.msra.mxu0 %v3370_v10  ;;  %1557 = vmatprep.subr.bf16.mxu1 %v3375_v11  ;;  %v3457_v10 = vld [vmem:[%s4852_s2 + $0x4e8] ss:$16 sps:$4 sm:$0xff]  }
  0x75   :  { %1479 = vmatprep.subr.bf16.mxu0 %v3378_v12  ;;  %v3460_v11 = vld [vmem:[%s4852_s2 + $0x328] ss:$16 sps:$4 sm:$0xff]   ;;  %v3465_v12 = vld [vmem:[%s4852_s2 + $0x50c] ss:$16 sps:$4 sm:$0xff]  }
  0x77   :  { %1558 = vmatpush1.bf16.msra.mxu1 %v3373_v13  ;;  %v3468_v13 = vld [vmem:[%s4852_s2 + $0x34c] ss:$16 sps:$4 sm:$0xff]  }
  0x78   :  { %1480 = vmatpush1.bf16.msra.mxu0 %v3376_v14  ;;  %1559 = vmatprep.subr.bf16.mxu1 %v3381_v15  ;;  %v3463_v14 = vld [vmem:[%s4852_s2 + $0x508] ss:$16 sps:$4 sm:$0xff]  }
  0x79   :  { %1481 = vmatprep.subr.bf16.mxu0 %v3384_v16  ;;  %v3466_v15 = vld [vmem:[%s4852_s2 + $0x348] ss:$16 sps:$4 sm:$0xff]   ;;  %v3471_v16 = vld [vmem:[%s4852_s2 + $0x52c] ss:$16 sps:$4 sm:$0xff]  }
  0x7b   :  { %1560 = vmatpush1.bf16.msra.mxu1 %v3379_v17  ;;  %v3474_v17 = vld [vmem:[%s4852_s2 + $0x36c] ss:$16 sps:$4 sm:$0xff]  }
  0x7c   :  { %1482 = vmatpush1.bf16.msra.mxu0 %v3382_v18  ;;  %1561 = vmatprep.subr.bf16.mxu1 %v3387_v19  ;;  %v3469_v18 = vld [vmem:[%s4852_s2 + $0x528] ss:$16 sps:$4 sm:$0xff]  }
  0x7d   :  { %1483 = vmatprep.subr.bf16.mxu0 %v3390_v20  ;;  %v3472_v19 = vld [vmem:[%s4852_s2 + $0x368] ss:$16 sps:$4 sm:$0xff]   ;;  %v3477_v20 = vld [vmem:[%s4852_s2 + $0x54c] ss:$16 sps:$4 sm:$0xff]  }
  0x7f   :  { %1562 = vmatpush1.bf16.msra.mxu1 %v3385_v21  ;;  %v3480_v21 = vld [vmem:[%s4852_s2 + $0x38c] ss:$16 sps:$4 sm:$0xff]  }
  0x80   :  { %1484 = vmatpush1.bf16.msra.mxu0 %v3388_v22  ;;  %1563 = vmatprep.subr.bf16.mxu1 %v3393_v23  ;;  %v3475_v22 = vld [vmem:[%s4852_s2 + $0x548] ss:$16 sps:$4 sm:$0xff]  }
  0x81   :  { %1485 = vmatprep.subr.bf16.mxu0 %v3396_v24  ;;  %v3478_v23 = vld [vmem:[%s4852_s2 + $0x388] ss:$16 sps:$4 sm:$0xff]   ;;  %v3483_v24 = vld [vmem:[%s4852_s2 + $0x56c] ss:$16 sps:$4 sm:$0xff]  }
  0x83   :  { %1564 = vmatpush1.bf16.msra.mxu1 %v3391_v25  ;;  %v3486_v25 = vld [vmem:[%s4852_s2 + $0x3ac] ss:$16 sps:$4 sm:$0xff]  }
  0x84   :  { %1486 = vmatpush1.bf16.msra.mxu0 %v3394_v26  ;;  %1565 = vmatprep.subr.bf16.mxu1 %v3399_v29  ;;  %v3481_v26 = vld [vmem:[%s4852_s2 + $0x568] ss:$16 sps:$4 sm:$0xff]  }
  0x85   :  { %1487 = vmatprep.subr.bf16.mxu0 %v3402_v30  ;;  %v3484_v29 = vld [vmem:[%s4852_s2 + $0x3a8] ss:$16 sps:$4 sm:$0xff]   ;;  %v3489_v30 = vld [vmem:[%s4852_s2 + $0x58c] ss:$16 sps:$4 sm:$0xff]  }
  0x87   :  { %1566 = vmatpush1.bf16.msra.mxu1 %v3397_v31  ;;  %v3492_v31 = vld [vmem:[%s4852_s2 + $0x3cc] ss:$16 sps:$4 sm:$0xff]  }
  0x88   :  { %1488 = vmatpush1.bf16.msra.mxu0 %v3400_v32  ;;  %1567 = vmatprep.subr.bf16.mxu1 %v3405_v34  ;;  %v3487_v32 = vld [vmem:[%s4852_s2 + $0x588] ss:$16 sps:$4 sm:$0xff]   ;;  %v3495_v34 = vld [vmem:[%s4852_s2 + $0x5ac] ss:$16 sps:$4 sm:$0xff]  }
  0x89   :  { %1580 = vmatprep.subr.bf16.mxu0 %v3408_v35  ;;  %v3498_v35 = vld [vmem:[%s4852_s2 + $0x3ec] ss:$16 sps:$4 sm:$0xff]  }
  0x8b   :  { %1490 = vmatmul.mubr.bf16.vlgmr.msra.gmra.mrb[8].mxu0 %v4190_v36  ;;  %1568 = vmatpush1.bf16.msra.mxu1 %v3403_v37  ;;  %v3493_v37 = vld [vmem:[%s4852_s2 + $0x5a8] ss:$16 sps:$4 sm:$0xff]  }
  0x8c   :  { %1581 = vmatpush1.bf16.msra.mxu0 %v3406_v39  ;;  %1569 = vmatprep.subr.bf16.mxu1 %v3411_v40  ;;  %v3496_v39 = vld [vmem:[%s4852_s2 + $0x3e8] ss:$16 sps:$4 sm:$0xff]   ;;  %v3501_v40 = vld [vmem:[%s4852_s2 + $0x5cc] ss:$16 sps:$4 sm:$0xff]  }
  0x8d   :  { %1582 = vmatprep.subr.bf16.mxu0 %v3414_v41  ;;  %1612 = vmatprep.mubr.bf16.mxu0 %v3910_v4  ;;  %v3426_v4 = vld [vmem:[%s4852_s2 + $0x26c] ss:$16 sps:$4 sm:$0xff]  }
  0x8e   :  { %v3504_v41 = vld [vmem:[%s4852_s2 + $0x60c] ss:$16 sps:$4 sm:$0xff]  }
  0x8f   :  { %1570 = vmatpush1.bf16.msra.mxu1 %v3409_v42  ;;  %v3499_v42 = vld [vmem:[%s4852_s2 + $0x5c8] ss:$16 sps:$4 sm:$0xff]  }
  0x90   :  { %1583 = vmatpush1.bf16.msra.mxu0 %v3412_v43  ;;  %1621 = vmatprep.subr.bf16.mxu1 %v3417_v44  ;;  %v3502_v43 = vld [vmem:[%s4852_s2 + $0x608] ss:$16 sps:$4 sm:$0xff]   ;;  %v3507_v44 = vld [vmem:[%s4852_s2 + $0x5ec] ss:$16 sps:$4 sm:$0xff]  }
  0x91   :  { %1584 = vmatprep.subr.bf16.mxu0 %v3420_v45  ;;  %v3510_v45 = vld [vmem:[%s4854_s5 + $0x4] ss:$16 sps:$4 sm:$0xff]  }
  0x92   :  { %1572 = vmatmul.mubr.bf16.vlgmr.msra.gmra.mrb[12].mxu1 %v3980_v27  ;;  %v3432_v27 = vld [vmem:[%s4852_s2 + $0x28c] ss:$16 sps:$4 sm:$0xff]  }
  0x93   :  { %1622 = vmatpush1.bf16.msra.mxu1 %v3415_v46  ;;  %1653 = vmatprep.mubr.bf16.mxu1 %v4052_v50  ;;  %v3438_v50 = vld [vmem:[%s4852_s2 + $0x2ac] ss:$16 sps:$4 sm:$0xff]   ;;  %v3505_v46 = vld [vmem:[%s4852_s2 + $0x5e8] ss:$16 sps:$4 sm:$0xff]  }
  0x94   :  { %1585 = vmatpush1.bf16.msra.mxu0 %v3418_v47  ;;  %1623 = vmatprep.subr.bf16.mxu1 %v3423_v48  ;;  %v3513_v47 = vld [vmem:[%s4854_s5 + $0xc] ss:$16 sps:$4 sm:$0xff]   ;;  %v3508_v48 = vld [vmem:[%s4854_s5] ss:$16 sps:$4 sm:$0xff]  }
  0x95   :  { %1586 = vmatprep.subr.bf16.mxu0 %v3426_v4  ;;  %v3516_v4 = vld [vmem:[%s4854_s5 + $0x24] ss:$16 sps:$4 sm:$0xff]  }
  0x97   :  { %1624 = vmatpush1.bf16.msra.mxu1 %v3421_v49  ;;  %v3519_v49 = vld [vmem:[%s4854_s5 + $0x2c] ss:$16 sps:$4 sm:$0xff]  }
  0x98   :  { %1587 = vmatpush1.bf16.msra.mxu0 %v3424_v51  ;;  %1625 = vmatprep.subr.bf16.mxu1 %v3429_v52  ;;  %v3514_v51 = vld [vmem:[%s4854_s5 + $0x20] ss:$16 sps:$4 sm:$0xff]   ;;  %v3517_v52 = vld [vmem:[%s4854_s5 + $0x28] ss:$16 sps:$4 sm:$0xff]  }
  0x99   :  { %1588 = vmatprep.subr.bf16.mxu0 %v3432_v27  ;;  %v3522_v27 = vld [vmem:[%s4854_s5 + $0x44] ss:$16 sps:$4 sm:$0xff]  }
  0x9b   :  { %1626 = vmatpush1.bf16.msra.mxu1 %v3427_v53  ;;  %v3525_v53 = vld [vmem:[%s4854_s5 + $0x4c] ss:$16 sps:$4 sm:$0xff]  }
  0x9c   :  { %1589 = vmatpush1.bf16.msra.mxu0 %v3430_v54  ;;  %1627 = vmatprep.subr.bf16.mxu1 %v3435_v55  ;;  %v3520_v54 = vld [vmem:[%s4854_s5 + $0x40] ss:$16 sps:$4 sm:$0xff]   ;;  %v3531_v55 = vld [vmem:[%s4854_s5 + $0x6c] ss:$16 sps:$4 sm:$0xff]  }
  0x9d   :  { %1590 = vmatprep.subr.bf16.mxu0 %v3438_v50  ;;  %v3526_v50 = vld [vmem:[%s4854_s5 + $0x60] ss:$16 sps:$4 sm:$0xff]  }
  0x9f   :  { %1628 = vmatpush1.bf16.msra.mxu1 %v3433_v56  ;;  %v3529_v56 = vld [vmem:[%s4854_s5 + $0x68] ss:$16 sps:$4 sm:$0xff]  }
  0xa0   :  { %1591 = vmatpush1.bf16.msra.mxu0 %v3436_v57  ;;  %1629 = vmatprep.subr.bf16.mxu1 %v3441_v58  ;;  %v3534_v57 = vld [vmem:[%s4854_s5 + $0x84] ss:$16 sps:$4 sm:$0xff]   ;;  %v3537_v58 = vld [vmem:[%s4854_s5 + $0x8c] ss:$16 sps:$4 sm:$0xff]  }
  0xa1   :  { %1592 = vmatprep.subr.bf16.mxu0 %v3444_v59 }
  0xa3   :  { %1630 = vmatpush1.bf16.msra.mxu1 %v3439_v60 }
  0xa4   :  { %1593 = vmatpush1.bf16.msra.mxu0 %v3442_v61  ;;  %1631 = vmatprep.subr.bf16.mxu1 %v3447_v62 }
  0xa5   :  { %1594 = vmatprep.subr.bf16.mxu0 %v3450_v63 }
  0xa7   :  { %1632 = vmatpush1.bf16.msra.mxu1 %v3445_v0 }
  0xa8   :  { %1595 = vmatpush1.bf16.msra.mxu0 %v3448_v1  ;;  %1633 = vmatprep.subr.bf16.mxu1 %v3453_v2  ;;  %v3532_v1 = vld [vmem:[%s4854_s5 + $0x80] ss:$16 sps:$4 sm:$0xff]   ;;  %v3535_v2 = vld [vmem:[%s4854_s5 + $0x88] ss:$16 sps:$4 sm:$0xff]  }
  0xa9   :  { %1596 = vmatprep.subr.bf16.mxu0 %v3456_v5 }
  0xab   :  { %1634 = vmatpush1.bf16.msra.mxu1 %v3451_v6 }
  0xac   :  { %1597 = vmatpush1.bf16.msra.mxu0 %v3454_v7  ;;  %1635 = vmatprep.subr.bf16.mxu1 %v3459_v8  ;;  %v3540_v7 = vld [vmem:[%s4854_s5 + $0xa4] ss:$16 sps:$4 sm:$0xff]   ;;  %v3543_v8 = vld [vmem:[%s4854_s5 + $0xac] ss:$16 sps:$4 sm:$0xff]  }
  0xad   :  { %1598 = vmatprep.subr.bf16.mxu0 %v3462_v9  ;;  %v3538_v9 = vld [vmem:[%s4854_s5 + $0xa0] ss:$16 sps:$4 sm:$0xff]  }
  0xaf   :  { %1636 = vmatpush1.bf16.msra.mxu1 %v3457_v10  ;;  %v3541_v10 = vld [vmem:[%s4854_s5 + $0xa8] ss:$16 sps:$4 sm:$0xff]  }
  0xb0   :  { %1599 = vmatpush1.bf16.msra.mxu0 %v3460_v11  ;;  %1637 = vmatprep.subr.bf16.mxu1 %v3465_v12  ;;  %v3546_v11 = vld [vmem:[%s4854_s5 + $0xc4] ss:$16 sps:$4 sm:$0xff]   ;;  %v3549_v12 = vld [vmem:[%s4854_s5 + $0xcc] ss:$16 sps:$4 sm:$0xff]  }
  0xb1   :  { %1600 = vmatprep.subr.bf16.mxu0 %v3468_v13  ;;  %v3544_v13 = vld [vmem:[%s4854_s5 + $0xc0] ss:$16 sps:$4 sm:$0xff]  }
  0xb3   :  { %1638 = vmatpush1.bf16.msra.mxu1 %v3463_v14  ;;  %v3547_v14 = vld [vmem:[%s4854_s5 + $0xc8] ss:$16 sps:$4 sm:$0xff]  }
  0xb4   :  { %1601 = vmatpush1.bf16.msra.mxu0 %v3466_v15  ;;  %1639 = vmatprep.subr.bf16.mxu1 %v3471_v16  ;;  %v3552_v15 = vld [vmem:[%s4854_s5 + $0xe4] ss:$16 sps:$4 sm:$0xff]   ;;  %v3555_v16 = vld [vmem:[%s4854_s5 + $0xec] ss:$16 sps:$4 sm:$0xff]  }
  0xb5   :  { %1602 = vmatprep.subr.bf16.mxu0 %v3474_v17  ;;  %v3550_v17 = vld [vmem:[%s4854_s5 + $0xe0] ss:$16 sps:$4 sm:$0xff]  }
  0xb7   :  { %1640 = vmatpush1.bf16.msra.mxu1 %v3469_v18  ;;  %v3553_v18 = vld [vmem:[%s4854_s5 + $0xe8] ss:$16 sps:$4 sm:$0xff]  }
  0xb8   :  { %1603 = vmatpush1.bf16.msra.mxu0 %v3472_v19  ;;  %1641 = vmatprep.subr.bf16.mxu1 %v3477_v20  ;;  %v3558_v19 = vld [vmem:[%s4854_s5 + $0x104] ss:$16 sps:$4 sm:$0xff]   ;;  %v3561_v20 = vld [vmem:[%s4854_s5 + $0x10c] ss:$16 sps:$4 sm:$0xff]  }
  0xb9   :  { %1604 = vmatprep.subr.bf16.mxu0 %v3480_v21  ;;  %v3556_v21 = vld [vmem:[%s4854_s5 + $0x100] ss:$16 sps:$4 sm:$0xff]  }
  0xbb   :  { %1642 = vmatpush1.bf16.msra.mxu1 %v3475_v22  ;;  %v3559_v22 = vld [vmem:[%s4854_s5 + $0x108] ss:$16 sps:$4 sm:$0xff]  }
  0xbc   :  { %1605 = vmatpush1.bf16.msra.mxu0 %v3478_v23  ;;  %1643 = vmatprep.subr.bf16.mxu1 %v3483_v24  ;;  %v3564_v23 = vld [vmem:[%s4854_s5 + $0x124] ss:$16 sps:$4 sm:$0xff]   ;;  %v3567_v24 = vld [vmem:[%s4854_s5 + $0x12c] ss:$16 sps:$4 sm:$0xff]  }
  0xbd   :  { %1606 = vmatprep.subr.bf16.mxu0 %v3486_v25  ;;  %v3562_v25 = vld [vmem:[%s4854_s5 + $0x120] ss:$16 sps:$4 sm:$0xff]  }
  0xbf   :  { %1644 = vmatpush1.bf16.msra.mxu1 %v3481_v26  ;;  %v3565_v26 = vld [vmem:[%s4854_s5 + $0x128] ss:$16 sps:$4 sm:$0xff]  }
  0xc0   :  { %1607 = vmatpush1.bf16.msra.mxu0 %v3484_v29  ;;  %1645 = vmatprep.subr.bf16.mxu1 %v3489_v30  ;;  %v3570_v29 = vld [vmem:[%s4854_s5 + $0x144] ss:$16 sps:$4 sm:$0xff]   ;;  %v3573_v30 = vld [vmem:[%s4854_s5 + $0x14c] ss:$16 sps:$4 sm:$0xff]  }
  0xc1   :  { %1608 = vmatprep.subr.bf16.mxu0 %v3492_v31  ;;  %v3568_v31 = vld [vmem:[%s4854_s5 + $0x140] ss:$16 sps:$4 sm:$0xff]  }
  0xc3   :  { %1646 = vmatpush1.bf16.msra.mxu1 %v3487_v32  ;;  %v3571_v32 = vld [vmem:[%s4854_s5 + $0x148] ss:$16 sps:$4 sm:$0xff]  }
  0xc4   :  { %1609 = vmatpush1.bf16.msra.mxu0 %v3490_v33  ;;  %1647 = vmatprep.subr.bf16.mxu1 %v3495_v34  ;;  %v3576_v33 = vld [vmem:[%s4854_s5 + $0x164] ss:$16 sps:$4 sm:$0xff]   ;;  %v3579_v34 = vld [vmem:[%s4854_s5 + $0x16c] ss:$16 sps:$4 sm:$0xff]  }
  0xc5   :  { %1610 = vmatprep.subr.bf16.mxu0 %v3498_v35  ;;  %v3574_v35 = vld [vmem:[%s4854_s5 + $0x160] ss:$16 sps:$4 sm:$0xff]  }
  0xc7   :  { %1648 = vmatpush1.bf16.msra.mxu1 %v3493_v37  ;;  %v3577_v37 = vld [vmem:[%s4854_s5 + $0x168] ss:$16 sps:$4 sm:$0xff]  }
  0xc8   :  { %1611 = vmatpush1.bf16.msra.mxu0 %v3496_v39  ;;  %1649 = vmatprep.subr.bf16.mxu1 %v3501_v40  ;;  %v3582_v39 = vld [vmem:[%s4854_s5 + $0x184] ss:$16 sps:$4 sm:$0xff]   ;;  %v3585_v40 = vld [vmem:[%s4854_s5 + $0x18c] ss:$16 sps:$4 sm:$0xff]  }
  0xc9   :  { %1662 = vmatprep.subr.bf16.mxu0 %v3504_v41  ;;  %v3580_v41 = vld [vmem:[%s4854_s5 + $0x180] ss:$16 sps:$4 sm:$0xff]  }
  0xcb   :  { %1613 = vmatmul.mubr.bf16.vlgmr.msra.gmra.mrb[12].mxu0 %v3982_v28  ;;  %1650 = vmatpush1.bf16.msra.mxu1 %v3499_v42  ;;  %v3511_v28 = vld [vmem:[%s4854_s5 + $0x8] ss:$16 sps:$4 sm:$0xff]  }
  0xcc   :  { %1663 = vmatpush1.bf16.msra.mxu0 %v3502_v43  ;;  %1651 = vmatprep.subr.bf16.mxu1 %v3507_v44  ;;  %v3583_v42 = vld [vmem:[%s4854_s5 + $0x188] ss:$16 sps:$4 sm:$0xff]   ;;  %v3588_v43 = vld [vmem:[%s4854_s5 + $0x1a4] ss:$16 sps:$4 sm:$0xff]   ;;  %v3591_v44 = vld [vmem:[%s4854_s5 + $0x1ac] ss:$16 sps:$4 sm:$0xff]  }
  0xcd   :  { %1694 = vmatprep.mubr.bf16.mxu0 %v3684_v3  ;;  %2362 = vmatprep.subr.bf16.mxu0 %v3510_v45  ;;  %v3586_v45 = vld [vmem:[%s4854_s5 + $0x1a0] ss:$16 sps:$4 sm:$0xff]  }
  0xcf   :  { %1652 = vmatpush1.bf16.msra.mxu1 %v3505_v46  ;;  %v3589_v46 = vld [vmem:[%s4854_s5 + $0x1a8] ss:$16 sps:$4 sm:$0xff]  }
  0xd0   :  { %2444 = vmatprep.subr.bf16.mxu1 %v3513_v47  ;;  %v3594_v47 = vld [vmem:[%s4854_s5 + $0x1c4] ss:$16 sps:$4 sm:$0xff]  }
  0xd2   :  { %1654 = vmatmul.mubr.bf16.vlgmr.msra.gmra.mrb[16].mxu1 %v4190_v36  ;;  %v3528_v36 = vld [vmem:[%s4854_s5 + $0x64] ss:$16 sps:$4 sm:$0xff]  }
  0xd3   :  { %3036 = vmatmul.mubr.msk.bf16.vlgmr.msra.gmra.mrb[16].mxu0 %vm1371_vm3, %v4014_v38  ;;  %2445 = vmatpush1.bf16.msra.mxu1 %v3511_v28  ;;  %v3523_v38 = vld [vmem:[%s4854_s5 + $0x48] ss:$16 sps:$4 sm:$0xff]   ;;  %v3592_v28 = vld [vmem:[%s4854_s5 + $0x1c0] ss:$16 sps:$4 sm:$0xff]  }
  0xd4   :  { %2363 = vmatpush1.bf16.msra.mxu0 %v3508_v48  ;;  %2446 = vmatprep.subr.bf16.mxu1 %v3519_v49  ;;  %v3597_v48 = vld [vmem:[%s4854_s5 + $0x1cc] ss:$16 sps:$4 sm:$0xff]   ;;  %v3600_v49 = vld [vmem:[%s4854_s5 + $0x1e4] ss:$16 sps:$4 sm:$0xff]  }
  0xd5   :  { %2364 = vmatprep.subr.bf16.mxu0 %v3516_v4  ;;  %v3595_v4 = vld [vmem:[%s4854_s5 + $0x1c8] ss:$16 sps:$4 sm:$0xff]  }
  0xd7   :  { %2447 = vmatpush1.bf16.msra.mxu1 %v3517_v52  ;;  %v3598_v52 = vld [vmem:[%s4854_s5 + $0x1e0] ss:$16 sps:$4 sm:$0xff]  }
  0xd8   :  { %2365 = vmatpush1.bf16.msra.mxu0 %v3514_v51  ;;  %2448 = vmatprep.subr.bf16.mxu1 %v3525_v53  ;;  %v3603_v51 = vld [vmem:[%s4854_s5 + $0x1ec] ss:$16 sps:$4 sm:$0xff]   ;;  %v3606_v53 = vld [vmem:[%s4854_s5 + $0x204] ss:$16 sps:$4 sm:$0xff]  }
  0xd9   :  { %2366 = vmatprep.subr.bf16.mxu0 %v3522_v27  ;;  %v3601_v27 = vld [vmem:[%s4854_s5 + $0x1e8] ss:$16 sps:$4 sm:$0xff]  }
  0xdb   :  { %2449 = vmatpush1.bf16.msra.mxu1 %v3523_v38 }
  0xdc   :  { %2367 = vmatpush1.bf16.msra.mxu0 %v3520_v54  ;;  %2450 = vmatprep.subr.bf16.mxu1 %v3531_v55  ;;  %v3609_v54 = vld [vmem:[%s4854_s5 + $0x20c] ss:$16 sps:$4 sm:$0xff]  }
  0xdd   :  { %2368 = vmatprep.subr.bf16.mxu0 %v3528_v36  ;;  %v4461_v60 = vpop.f32.mrb[0].mxu1 }
  0xde   :  { %v4459_v59 = vpop.f32.mrb[0].mxu0  ;;  %v4465_v62 = vpop.f32.mrb[1].mxu1 }
  0xdf   :  { %v4463_v61 = vpop.f32.mrb[1].mxu0  ;;  %v388_v0 = vpop.f32.mrb[2].mxu1  ;;  %2451 = vmatpush1.bf16.msra.mxu1 %v3529_v56 }
  0xe0   :  { %v347_v63 = vpop.f32.mrb[2].mxu0  ;;  %2369 = vmatpush1.bf16.msra.mxu0 %v3526_v50  ;;  %v389_v6 = vpop.f32.mrb[3].mxu1  ;;  %2452 = vmatprep.subr.bf16.mxu1 %v3537_v58 }
  0xe1   :  { %v348_v5 = vpop.f32.mrb[3].mxu0  ;;  %2370 = vmatprep.subr.bf16.mxu0 %v3534_v57 }
  0xe3   :  { %2453 = vmatpush1.bf16.msra.mxu1 %v3535_v2 }
  0xe4   :  { %2371 = vmatpush1.bf16.msra.mxu0 %v3532_v1  ;;  %2454 = vmatprep.subr.bf16.mxu1 %v3543_v8 }
  0xe5   :  { %2372 = vmatprep.subr.bf16.mxu0 %v3540_v7 }
  0xe7   :  { %2455 = vmatpush1.bf16.msra.mxu1 %v3541_v10  ;;  %v1705_v10 = vlaneseq }
  0xe8   :  { %2373 = vmatpush1.bf16.msra.mxu0 %v3538_v9  ;;  %2456 = vmatprep.subr.bf16.mxu1 %v3549_v12 }
  0xe9   :  { %2374 = vmatprep.subr.bf16.mxu0 %v3546_v11  ;;  %v4613_v11 = vshrl.u32 %v1705_v10, 7 }
  0xeb   :  { %2457 = vmatpush1.bf16.msra.mxu1 %v3547_v14  ;;  %v1707_v12 = vsub.s32 0, %v4613_v11 }
  0xec   :  { %2375 = vmatpush1.bf16.msra.mxu0 %v3544_v13  ;;  %2458 = vmatprep.subr.bf16.mxu1 %v3555_v16 }
  0xed   :  { %2376 = vmatprep.subr.bf16.mxu0 %v3552_v15 }
  0xef   :  { %2459 = vmatpush1.bf16.msra.mxu1 %v3553_v18 }
  0xf0   :  { %2377 = vmatpush1.bf16.msra.mxu0 %v3550_v17  ;;  %2460 = vmatprep.subr.bf16.mxu1 %v3561_v20 }
  0xf1   :  { %2378 = vmatprep.subr.bf16.mxu0 %v3558_v19 }
  0xf3   :  { %2461 = vmatpush1.bf16.msra.mxu1 %v3559_v22 }
  0xf4   :  { %2379 = vmatpush1.bf16.msra.mxu0 %v3556_v21  ;;  %2462 = vmatprep.subr.bf16.mxu1 %v3567_v24 }
  0xf5   :  { %2380 = vmatprep.subr.bf16.mxu0 %v3564_v23 }
  0xf7   :  { %2463 = vmatpush1.bf16.msra.mxu1 %v3565_v26 }
  0xf8   :  { %2381 = vmatpush1.bf16.msra.mxu0 %v3562_v25  ;;  %2464 = vmatprep.subr.bf16.mxu1 %v3573_v30 }
  0xf9   :  { %2382 = vmatprep.subr.bf16.mxu0 %v3570_v29 }
  0xfb   :  { %2465 = vmatpush1.bf16.msra.mxu1 %v3571_v32 }
  0xfc   :  { %2383 = vmatpush1.bf16.msra.mxu0 %v3568_v31  ;;  %2466 = vmatprep.subr.bf16.mxu1 %v3579_v34 }
  0xfd   :  { %2384 = vmatprep.subr.bf16.mxu0 %v3576_v33 }
  0xff   :  { %2467 = vmatpush1.bf16.msra.mxu1 %v3577_v37  ;;  %v3607_v37 = vld [vmem:[%s4854_s5 + $0x208] ss:$16 sps:$4 sm:$0xff]  }
 0x100   :  { %2385 = vmatpush1.bf16.msra.mxu0 %v3574_v35  ;;  %2468 = vmatprep.subr.bf16.mxu1 %v3585_v40  ;;  %v3604_v35 = vld [vmem:[%s4854_s5 + $0x200] ss:$16 sps:$4 sm:$0xff]  }
 0x101   :  { %2386 = vmatprep.subr.bf16.mxu0 %v3582_v39 }
 0x103   :  { %2469 = vmatpush1.bf16.msra.mxu1 %v3583_v42  ;;  %v3613_v42 = vld [vmem:[%s4854_s5 + $0x228] ss:$16 sps:$4 sm:$0xff]  }
 0x104   :  { %2387 = vmatpush1.bf16.msra.mxu0 %v3580_v41  ;;  %2470 = vmatprep.subr.bf16.mxu1 %v3591_v44  ;;  %v3610_v41 = vld [vmem:[%s4854_s5 + $0x220] ss:$16 sps:$4 sm:$0xff]   ;;  %v3621_v44 = vld [vmem:[%s4854_s5 + $0x24c] ss:$16 sps:$4 sm:$0xff]  }
 0x105   :  { %2388 = vmatprep.subr.bf16.mxu0 %v3588_v43  ;;  %v3618_v43 = vld [vmem:[%s4854_s5 + $0x244] ss:$16 sps:$4 sm:$0xff]  }
 0x107   :  { %2471 = vmatpush1.bf16.msra.mxu1 %v3589_v46  ;;  %v3619_v46 = vld [vmem:[%s4854_s5 + $0x248] ss:$16 sps:$4 sm:$0xff]  }
 0x108   :  { %2389 = vmatpush1.bf16.msra.mxu0 %v3586_v45  ;;  %2472 = vmatprep.subr.bf16.mxu1 %v3597_v48  ;;  %v3616_v45 = vld [vmem:[%s4854_s5 + $0x240] ss:$16 sps:$4 sm:$0xff]   ;;  %v3627_v48 = vld [vmem:[%s4854_s5 + $0x26c] ss:$16 sps:$4 sm:$0xff]  }
 0x109   :  { %2390 = vmatprep.subr.bf16.mxu0 %v3594_v47  ;;  %v3624_v47 = vld [vmem:[%s4854_s5 + $0x264] ss:$16 sps:$4 sm:$0xff]  }
 0x10b   :  { %2473 = vmatpush1.bf16.msra.mxu1 %v3595_v4  ;;  %v3625_v4 = vld [vmem:[%s4854_s5 + $0x268] ss:$16 sps:$4 sm:$0xff]  }
 0x10c   :  { %2391 = vmatpush1.bf16.msra.mxu0 %v3592_v28  ;;  %2474 = vmatprep.subr.bf16.mxu1 %v3603_v51  ;;  %v3622_v28 = vld [vmem:[%s4854_s5 + $0x260] ss:$16 sps:$4 sm:$0xff]   ;;  %v3633_v51 = vld [vmem:[%s4854_s5 + $0x28c] ss:$16 sps:$4 sm:$0xff]  }
 0x10d   :  { %2392 = vmatprep.subr.bf16.mxu0 %v3600_v49  ;;  %v3630_v49 = vld [vmem:[%s4854_s5 + $0x284] ss:$16 sps:$4 sm:$0xff]  }
 0x10f   :  { %2475 = vmatpush1.bf16.msra.mxu1 %v3601_v27  ;;  %v3631_v27 = vld [vmem:[%s4854_s5 + $0x288] ss:$16 sps:$4 sm:$0xff]  }
 0x110   :  { %2393 = vmatpush1.bf16.msra.mxu0 %v3598_v52  ;;  %2485 = vmatprep.subr.bf16.mxu1 %v3609_v54  ;;  %v3628_v52 = vld [vmem:[%s4854_s5 + $0x280] ss:$16 sps:$4 sm:$0xff]   ;;  %v3639_v54 = vld [vmem:[%s4854_s5 + $0x2ac] ss:$16 sps:$4 sm:$0xff]  }
 0x111   :  { %2403 = vmatprep.subr.bf16.mxu0 %v3606_v53  ;;  %v3636_v53 = vld [vmem:[%s4854_s5 + $0x2a4] ss:$16 sps:$4 sm:$0xff]  }
 0x11d   :  { %v1450_v36 = vpop.f32.mrb[4].mxu1 }
 0x11e   :  { %v1409_v38 = vpop.f32.mrb[4].mxu0  ;;  %v1452_v56 = vpop.f32.mrb[5].mxu1 }
 0x11f   :  { %v1410_v55 = vadd.f32 %v1409_v38, %v4459_v59  ;;  %v1411_v50 = vpop.f32.mrb[5].mxu0  ;;  %v1454_v63 = vpop.f32.mrb[6].mxu1  ;;  %v4619_v59 = vld [vmem:[%s4856_s4] sm:$0xf] }
 0x120   :  { %v1412_v57 = vadd.f32 %v1411_v50, %v4463_v61  ;;  %v1413_v58 = vpop.f32.mrb[6].mxu0  ;;  %v1455_v2 = vpop.f32.mrb[7].mxu1  ;;  %v1711_v61 = vsub.s32 1, %v4613_v11  ;;  %v1708_v15 = vrot.slane %v4619_v59, %v1707_v12  ;;  %v3634_v38 = vld [vmem:[%s4854_s5 + $0x2a0] ss:$16 sps:$4 sm:$0xff]  }
 0x121   :  { %v1451_v0 = vadd.f32 %v1450_v36, %v1410_v55  ;;  %v1414_v1 = vpop.f32.mrb[7].mxu0  ;;  %v3637_v36 = vld [vmem:[%s4854_s5 + $0x2a8] ss:$16 sps:$4 sm:$0xff]   ;;  %v3642_v55 = vld [vmem:[%s4854_s5 + $0x2c4] ss:$16 sps:$4 sm:$0xff]  }
 0x122   :  { %v1453_v5 = vadd.f32 %v1452_v56, %v1412_v57  ;;  %v1712_v18 = vrot.slane %v4619_v59, %v1711_v61  ;;  %v3645_v50 = vld [vmem:[%s4854_s5 + $0x2cc] ss:$16 sps:$4 sm:$0xff]   ;;  %v3640_v56 = vld [vmem:[%s4854_s5 + $0x2c0] ss:$16 sps:$4 sm:$0xff]   ;;  %v3643_v57 = vld [vmem:[%s4854_s5 + $0x2c8] ss:$16 sps:$4 sm:$0xff]  }
 0x123   :  { %v3648_v58 = vld [vmem:[%s4854_s5 + $0x2e4] ss:$16 sps:$4 sm:$0xff]   ;;  %v3651_v63 = vld [vmem:[%s4854_s5 + $0x2ec] ss:$16 sps:$4 sm:$0xff]   ;;  %v3649_v1 = vld [vmem:[%s4854_s5 + $0x2e8] ss:$16 sps:$4 sm:$0xff]  }
 0x124   :  { %v3654_v2 = vld [vmem:[%s4854_s5 + $0x304] ss:$16 sps:$4 sm:$0xff]  }
 0x125   :  { %v1532_v6 = vpop.f32.mrb[8].mxu1 }
 0x126   :  { %v1534_v7 = vpop.f32.mrb[9].mxu1 }
 0x127   :  { %v1536_v8 = vpop.f32.mrb[10].mxu1 }
 0x128   :  { %v1537_v9 = vpop.f32.mrb[11].mxu1  ;;  %v3659_v8 = vld [vmem:[%s4855_s7 + $0x40] sm:$0xff]  }
 0x15e   :  { %v1491_v13 = vpop.f32.mrb[8].mxu0 }
 0x15f   :  { %v1492_v14 = vadd.f32 %v1491_v13, %v1451_v0  ;;  %v1493_v16 = vpop.f32.mrb[9].mxu0  ;;  %v3646_v0 = vld [vmem:[%s4854_s5 + $0x2e0] ss:$16 sps:$4 sm:$0xff]  }
 0x160   :  { %v1494_v17 = vadd.f32 %v1493_v16, %v1453_v5  ;;  %v1495_v19 = vpop.f32.mrb[10].mxu0  ;;  %v3657_v5 = vld [vmem:[%s4854_s5 + $0x30c] ss:$16 sps:$4 sm:$0xff]  }
 0x161   :  { %v1533_v20 = vadd.f32 %v1532_v6, %v1492_v14  ;;  %v1496_v21 = vpop.f32.mrb[11].mxu0  ;;  %v3652_v6 = vld [vmem:[%s4854_s5 + $0x300] ss:$16 sps:$4 sm:$0xff]  }
 0x162   :  { %v1535_v22 = vadd.f32 %v1534_v7, %v1494_v17  ;;  %v3655_v7 = vld [vmem:[%s4854_s5 + $0x308] ss:$16 sps:$4 sm:$0xff]   ;;  %v1715_v17 = vsub.s32 2, %v4613_v11 }
 0x163   :  { %v1725_v23 = vadd.f32 %v1708_v15, %v1533_v20 }
 0x164   :  { %v1726_v24 = vadd.f32 %v1712_v18, %v1535_v22  ;;  %v1719_v18 = vsub.s32 3, %v4613_v11 }
 0x165   :  { %v1729_v25 = vmax.f32 %v1725_v23, 0.0  ;;  %v1573_v26 = vpop.f32.mrb[12].mxu1  ;;  %v1716_v23 = vrot.slane %v4619_v59, %v1715_v17 }
 0x166   :  { %v1730_v29 = vmax.f32 %v1726_v24, 0.0  ;;  %v4629_v30 = vadd.f32 %v1573_v26, %v4461_v60  ;;  %v1575_v31 = vpop.f32.mrb[13].mxu1  ;;  %v3612_v60 = vld [vmem:[%s4854_s5 + $0x224] ss:$16 sps:$4 sm:$0xff]  }
 0x167   :  { %v4632_v32 = vadd.f32 %v1575_v31, %v4465_v62  ;;  %v1577_v33 = vpop.f32.mrb[14].mxu1  ;;  %v1733_v39 = vpack.c.bf16 %v1729_v25, %v1729_v25  ;;  %v3615_v62 = vld [vmem:[%s4854_s5 + $0x22c] ss:$16 sps:$4 sm:$0xff]  }
 0x168   :  { %v1734_v34 = vpack.c.bf16 %v1730_v29, %v1730_v29  ;;  %v1578_v40 = vpop.f32.mrb[15].mxu1  ;;  %v1720_v29 = vrot.slane %v4619_v59, %v1719_v18  ;;  %v3662_v59 = vld [vmem:[%s4855_s7 + $0x48] sm:$0xff]  }
 0x16a   :  { %2394 = vmatprep.mubr.bf16.mxu0 %v1734_v34  ;;  %2476 = vmatprep.mubr.bf16.mxu1 %v1734_v34 }
 0x16b   :  { %2395 = vmatmul.mubr.bf16.vlgmr.msra.gmra.mrb[20].mxu0 %v1733_v39  ;;  %2477 = vmatmul.mubr.bf16.vlgmr.msra.gmra.mrb[20].mxu1 %v1733_v39 }
 0x16c   :  { %2404 = vmatpush1.bf16.msra.mxu0 %v3604_v35  ;;  %2486 = vmatpush1.bf16.msra.mxu1 %v3607_v37 }
 0x16d   :  { %2405 = vmatprep.subr.bf16.mxu0 %v3612_v60  ;;  %2487 = vmatprep.subr.bf16.mxu1 %v3615_v62  ;;  %v3658_v62 = vld [vmem:[%s4855_s7 + $0x80] sm:$0xff]  }
 0x170   :  { %2406 = vmatpush1.bf16.msra.mxu0 %v3610_v41  ;;  %2488 = vmatpush1.bf16.msra.mxu1 %v3613_v42  ;;  %v3660_v41 = vld [vmem:[%s4855_s7] sm:$0xff]  }
 0x171   :  { %2407 = vmatprep.subr.bf16.mxu0 %v3618_v43  ;;  %2489 = vmatprep.subr.bf16.mxu1 %v3621_v44  ;;  %v3661_v43 = vld [vmem:[%s4855_s7 + $0x88] sm:$0xff]  }
 0x172   :  { %v3663_v44 = vld [vmem:[%s4855_s7 + $0x8] sm:$0xff]  }
 0x174   :  { %2408 = vmatpush1.bf16.msra.mxu0 %v3616_v45  ;;  %2490 = vmatpush1.bf16.msra.mxu1 %v3619_v46  ;;  %v3665_v45 = vld [vmem:[%s4855_s7 + $0x50] sm:$0xff]  }
 0x175   :  { %2409 = vmatprep.subr.bf16.mxu0 %v3624_v47  ;;  %2491 = vmatprep.subr.bf16.mxu1 %v3627_v48  ;;  %v3664_v46 = vld [vmem:[%s4855_s7 + $0x90] sm:$0xff]   ;;  %v3668_v48 = vld [vmem:[%s4855_s7 + $0x58] sm:$0xff]  }
 0x176   :  { %v3666_v47 = vld [vmem:[%s4855_s7 + $0x10] sm:$0xff]  }
 0x178   :  { %2410 = vmatpush1.bf16.msra.mxu0 %v3622_v28  ;;  %2492 = vmatpush1.bf16.msra.mxu1 %v3625_v4  ;;  %v3667_v28 = vld [vmem:[%s4855_s7 + $0x98] sm:$0xff]  }
 0x179   :  { %2411 = vmatprep.subr.bf16.mxu0 %v3630_v49  ;;  %2493 = vmatprep.subr.bf16.mxu1 %v3633_v51  ;;  %v3669_v4 = vld [vmem:[%s4855_s7 + $0x18] sm:$0xff]   ;;  %v3671_v49 = vld [vmem:[%s4855_s7 + $0x60] sm:$0xff]  }
 0x17a   :  { %v3670_v51 = vld [vmem:[%s4855_s7 + $0xa0] sm:$0xff]  }
 0x17c   :  { %2412 = vmatpush1.bf16.msra.mxu0 %v3628_v52  ;;  %2494 = vmatpush1.bf16.msra.mxu1 %v3631_v27  ;;  %v3672_v52 = vld [vmem:[%s4855_s7 + $0x20] sm:$0xff]   ;;  %v3674_v27 = vld [vmem:[%s4855_s7 + $0x68] sm:$0xff]  }
 0x17d   :  { %2413 = vmatprep.subr.bf16.mxu0 %v3636_v53  ;;  %2495 = vmatprep.subr.bf16.mxu1 %v3639_v54  ;;  %v3673_v53 = vld [vmem:[%s4855_s7 + $0xa8] sm:$0xff]  }
 0x17e   :  { %v3675_v54 = vld [vmem:[%s4855_s7 + $0x28] sm:$0xff]  }
 0x180   :  { %2414 = vmatpush1.bf16.msra.mxu0 %v3634_v38  ;;  %2496 = vmatpush1.bf16.msra.mxu1 %v3637_v36  ;;  %v3676_v38 = vld [vmem:[%s4855_s7 + $0xb0] sm:$0xff]  }
 0x181   :  { %2415 = vmatprep.subr.bf16.mxu0 %v3642_v55  ;;  %2497 = vmatprep.subr.bf16.mxu1 %v3645_v50  ;;  %v3677_v36 = vld [vmem:[%s4855_s7 + $0x70] sm:$0xff]   ;;  %v3679_v50 = vld [vmem:[%s4855_s7 + $0xb8] sm:$0xff]  }
 0x182   :  { %v3678_v55 = vld [vmem:[%s4855_s7 + $0x30] sm:$0xff]  }
 0x184   :  { %2416 = vmatpush1.bf16.msra.mxu0 %v3640_v56  ;;  %2498 = vmatpush1.bf16.msra.mxu1 %v3643_v57  ;;  %v3680_v56 = vld [vmem:[%s4855_s7 + $0x78] sm:$0xff]  }
 0x185   :  { %2417 = vmatprep.subr.bf16.mxu0 %v3648_v58  ;;  %2499 = vmatprep.subr.bf16.mxu1 %v3651_v63  ;;  %v3681_v57 = vld [vmem:[%s4855_s7 + $0x38] sm:$0xff]   ;;  %v3682_v58 = vld [vmem:[%s4855_s7 + $0xc0] sm:$0xff]  }
 0x186   :  { %v1837_v63 = vld [vmem:[%s4857_s6] sm:$0xf] }
 0x188   :  { %2418 = vmatpush1.bf16.msra.mxu0 %v3646_v0  ;;  %2500 = vmatpush1.bf16.msra.mxu1 %v3649_v1  ;;  %v1842_v0 = vrot.slane %v1837_v63, %v1707_v12  ;;  %v1846_v1 = vrot.slane %v1837_v63, %v1711_v61 }
 0x189   :  { %2419 = vmatprep.subr.bf16.mxu0 %v3654_v2  ;;  %2501 = vmatprep.subr.bf16.mxu1 %v3657_v5  ;;  %v1854_v2 = vrot.slane %v1837_v63, %v1719_v18 }
 0x18c   :  { %2420 = vmatpush1.bf16.msra.mxu0 %v3652_v6  ;;  %2502 = vmatpush1.bf16.msra.mxu1 %v3655_v7 }
 0x18d   :  { %2784 = vmatprep.subr.bf16.mxu1 %v3684_v3  ;;  %3166 = vmatprep.subr.bf16.mxu0 %v3659_v8 }
 0x19e   :  { %v1614_v9 = vpop.f32.mrb[12].mxu0 }
 0x19f   :  { %v1615_v10 = vadd.f32 %v1614_v9, %v4629_v30  ;;  %v1616_v13 = vpop.f32.mrb[13].mxu0 }
 0x1a0   :  { %v1617_v14 = vadd.f32 %v1616_v13, %v4632_v32  ;;  %v1618_v15 = vpop.f32.mrb[14].mxu0 }
 0x1a1   :  { %v1619_v16 = vpop.f32.mrb[15].mxu0 }
 0x1a5   :  { %v1655_v19 = vpop.f32.mrb[16].mxu1 }
 0x1a6   :  { %v1696_v20 = vpop.f32.mrb[16].mxu0  ;;  %v1656_v21 = vadd.f32 %v1655_v19, %v1615_v10  ;;  %v1657_v22 = vpop.f32.mrb[17].mxu1 }
 0x1a7   :  { %v1698_v24 = vpop.f32.mrb[17].mxu0  ;;  %v1658_v25 = vadd.f32 %v1657_v22, %v1617_v14  ;;  %v1659_v26 = vpop.f32.mrb[18].mxu1 }
 0x1a8   :  { %v1700_v30 = vpop.f32.mrb[18].mxu0  ;;  %v1697_v31 = vadd.f32 %v1696_v20, %v1656_v21  ;;  %v1660_v32 = vpop.f32.mrb[19].mxu1  ;;  %v3139_v26 = vld [vmem:[%s4858_s8] ss:$0 sm:$0xff] }
 0x1a9   :  { %v1701_v33 = vpop.f32.mrb[19].mxu0  ;;  %v1699_v34 = vadd.f32 %v1698_v24, %v1658_v25 }
 0x1aa   :  { %v1727_v35 = vadd.f32 %v1716_v23, %v1697_v31 }
 0x1ab   :  { %v1728_v37 = vadd.f32 %v1720_v29, %v1699_v34 }
 0x1ac   :  { %v1731_v39 = vmax.f32 %v1727_v35, 0.0 }
 0x1ad   :  { %v1732_v40 = vmax.f32 %v1728_v37, 0.0 }
 0x1ae   :  { %v1735_v42 = vpack.c.bf16 %v1731_v39, %v1731_v39 }
 0x1af   :  { %v1736_v60 = vpack.c.bf16 %v1732_v40, %v1732_v40 }
 0x1b1   :  { %3137 = vmatprep.mubr.msk.bf16.mxu0 %vm1371_vm3, %v1736_v60  ;;  %3138 = vmatprep.mubr.msk.bf16.mxu1 %vm1371_vm3, %v1736_v60 }
 0x1b2   :  { %2436 = vmatmul.mubr.bf16.vlgmr.msra.gmra.mrb[20].mxu0 %v1735_v42  ;;  %2518 = vmatmul.mubr.bf16.vlgmr.msra.gmra.mrb[20].mxu1 %v1735_v42 }
 0x1b3   :  { %2785 = vmatpush1.bf16.msra.mxu1 %v3658_v62  ;;  %3167 = vmatpush3.bf16.msra.mxu0 %v3660_v41 }
 0x1b4   :  { %2786 = vmatprep.subr.bf16.mxu1 %v3684_v3  ;;  %3168 = vmatprep.subr.bf16.mxu0 %v3662_v59 }
 0x1b7   :  { %2787 = vmatpush1.bf16.msra.mxu1 %v3661_v43  ;;  %3169 = vmatpush3.bf16.msra.mxu0 %v3663_v44 }
 0x1b8   :  { %2788 = vmatprep.subr.bf16.mxu1 %v3684_v3  ;;  %3170 = vmatprep.subr.bf16.mxu0 %v3665_v45 }
 0x1bb   :  { %2789 = vmatpush1.bf16.msra.mxu1 %v3664_v46  ;;  %3171 = vmatpush3.bf16.msra.mxu0 %v3666_v47 }
 0x1bc   :  { %2790 = vmatprep.subr.bf16.mxu1 %v3684_v3  ;;  %3172 = vmatprep.subr.bf16.mxu0 %v3668_v48 }
 0x1bf   :  { %2791 = vmatpush1.bf16.msra.mxu1 %v3667_v28  ;;  %3173 = vmatpush3.bf16.msra.mxu0 %v3669_v4 }
 0x1c0   :  { %2792 = vmatprep.subr.bf16.mxu1 %v3684_v3  ;;  %3174 = vmatprep.subr.bf16.mxu0 %v3671_v49 }
 0x1c3   :  { %2793 = vmatpush1.bf16.msra.mxu1 %v3670_v51  ;;  %3175 = vmatpush3.bf16.msra.mxu0 %v3672_v52 }
 0x1c4   :  { %2794 = vmatprep.subr.bf16.mxu1 %v3684_v3  ;;  %3176 = vmatprep.subr.bf16.mxu0 %v3674_v27 }
 0x1c7   :  { %2795 = vmatpush1.bf16.msra.mxu1 %v3673_v53  ;;  %3177 = vmatpush3.bf16.msra.mxu0 %v3675_v54 }
 0x1c8   :  { %2796 = vmatprep.subr.bf16.mxu1 %v3684_v3  ;;  %3178 = vmatprep.subr.bf16.mxu0 %v3677_v36 }
 0x1cb   :  { %2797 = vmatpush1.bf16.msra.mxu1 %v3676_v38  ;;  %3179 = vmatpush3.bf16.msra.mxu0 %v3678_v55 }
 0x1cc   :  { %2798 = vmatprep.subr.bf16.mxu1 %v3684_v3  ;;  %3180 = vmatprep.subr.bf16.mxu0 %v3680_v56 }
 0x1cf   :  { %2799 = vmatpush1.bf16.msra.mxu1 %v3679_v50  ;;  %3181 = vmatpush3.bf16.msra.mxu0 %v3681_v57 }
 0x1d0   :  { %2800 = vmatprep.subr.bf16.mxu1 %v3684_v3  ;;  %v1850_v3 = vrot.slane %v1837_v63, %v1715_v17 }
 0x1d3   :  { %2801 = vmatpush1.bf16.msra.mxu1 %v3682_v58 }
 0x285   :  { %v2437_v5 = vpop.f32.mrb[20].mxu0  ;;  %v2519_v6 = vpop.f32.mrb[20].mxu1 }
 0x286   :  { %v3188_v7 = vadd.f32 %v2437_v5, %v1842_v0  ;;  %v3190_v8 = vadd.f32 %v2519_v6, %v1850_v3  ;;  %v2439_v9 = vpop.f32.mrb[21].mxu0  ;;  %v2521_v10 = vpop.f32.mrb[21].mxu1 }
 0x287   :  { %v3189_v13 = vadd.f32 %v2439_v9, %v1846_v1  ;;  %v3191_v14 = vadd.f32 %v2521_v10, %v1854_v2  ;;  %v2441_v15 = vpop.f32.mrb[22].mxu0  ;;  %v2523_v16 = vpop.f32.mrb[22].mxu1 }
 0x288   :  { %v2526_v12 = vmax.f32 %v3188_v7, 0.0  ;;  %v2528_v19 = vmax.f32 %v3190_v8, 0.0  ;;  %v2442_v20 = vpop.f32.mrb[23].mxu0  ;;  %v2524_v17 = vpop.f32.mrb[23].mxu1 }
 0x289   :  { %v2527_v21 = vmax.f32 %v3189_v13, 0.0  ;;  %v2529_v22 = vmax.f32 %v3191_v14, 0.0 }
 0x28a   :  { %v2530_v11 = vpack.c.bf16 %v2526_v12, %v2526_v12  ;;  %v2532_v18 = vpack.c.bf16 %v2528_v19, %v2528_v19 }
 0x28b   :  { %v2531_v61 = vpack.c.bf16 %v2527_v21, %v2527_v21  ;;  %v2533_v23 = vpack.c.bf16 %v2529_v22, %v2529_v22 }
 0x28d   :  { %2776 = vmatprep.mubr.bf16.mxu0 %v2531_v61  ;;  %3165 = vmatprep.mubr.msk.bf16.mxu1 %vm1371_vm3, %v2533_v23 }
 0x28e   :  { %2777 = vmatmul.mubr.bf16.vlgmr.msra.gmra.mrb[24].mxu0 %v2530_v11  ;;  %2817 = vmatmul.mubr.bf16.vlgmr.msra.gmra.mrb[24].mxu1 %v2532_v18 }
 0x361   :  { %v3182_v24 = vpop.f32.mrb[24].mxu0  ;;  %v2818_v25 = vpop.f32.mrb[24].mxu1 }
 0x362   :  { %v3183_v29 = vpop.f32.mrb[25].mxu0  ;;  %v2820_v30 = vpop.f32.mrb[25].mxu1 }
 0x363   :  { %v3184_v31 = vadd.f32 %v3183_v29, %v3182_v24  ;;  %v3185_v32 = vpop.f32.mrb[26].mxu0  ;;  %v2821_v33 = vpop.f32.mrb[26].mxu1 }
 0x364   :  { %v3186_v34 = vpop.f32.mrb[27].mxu0  ;;  %v2822_v35 = vpop.f32.mrb[27].mxu1 }
 0x365   :  { %v2779_v37 = vadd.f32 %v3184_v31, %v3139_v26 }
 0x367   :  { %v2819_v39 = vadd.f32 %v2818_v25, %v2779_v37 }
 0x369   :  { %2824 = vst [vmem:[%s4859_s9] sm:$0xff] %v2819_v39 }

</bundles_post_ra>
